<compile_context>
chip_gen: v6e
topology: v6e:2x2x1
jax: 0.10.0
libtpu: 0.0.40
codegen_flags: <defaults>
</compile_context>

<pallas_src>
import functools

import jax
import jax.numpy as jnp
from jax.experimental import pallas as pl
from jax.experimental.pallas import tpu as pltpu

BN_EPS = 1e-5
LANE = 128


def _round_up(v, m):
    return (v + m - 1) // m * m


def _mlp3_kernel(x_ref, w1_ref, w2_ref, w3_ref, b3_ref,
                 g1_ref, be1_ref, g2_ref, be2_ref,
                 o_ref,
                 sum_ref, sq_ref, sc_ref, sh_ref,
                 *, n_true, pad_rows):
    p = pl.program_id(0)                       # phase: 0, 1, 2
    i = pl.program_id(1)                       # row tile
    hp = sum_ref.shape[1]

    def matmul(a, w_ref):
        return jnp.dot(a.astype(jnp.bfloat16), w_ref[...],
                       preferred_element_type=jnp.float32)

    def accumulate(y, l):
        """Accumulate per-feature sum / sum-of-squares of pre-BN activations."""
        @pl.when(i == 0)
        def _():
            sum_ref[l:l + 1, :] = jnp.zeros((1, hp), jnp.float32)
            sq_ref[l:l + 1, :] = jnp.zeros((1, hp), jnp.float32)
        sum_ref[l:l + 1, :] += jnp.sum(y, axis=0, keepdims=True)
        sq_ref[l:l + 1, :] += jnp.sum(y * y, axis=0, keepdims=True)

    def finalize(l, g_ref, be_ref, pad_corr=None):
        """Fold batch stats + BN affine into one per-feature scale/shift.

        `pad_corr`, if given, returns the (1, hp) pre-BN activation that every
        padded batch row contributed to this layer's stats; it is subtracted
        `pad_rows` times so mean/var are over the true batch only.
        """
        s_acc = sum_ref[l:l + 1, :]
        q_acc = sq_ref[l:l + 1, :]
        if pad_corr is not None:
            y_pad = pad_corr()
            s_acc = s_acc - pad_rows * y_pad
            q_acc = q_acc - pad_rows * (y_pad * y_pad)
        inv_n = 1.0 / n_true
        mean = s_acc * inv_n
        var = q_acc * inv_n - mean * mean      # biased variance (training BN)
        s = g_ref[...] * jax.lax.rsqrt(var + BN_EPS)
        sc_ref[l:l + 1, :] = s
        sh_ref[l:l + 1, :] = be_ref[...] - mean * s

    def bn_relu(y, l):
        return jnp.maximum(y * sc_ref[l:l + 1, :] + sh_ref[l:l + 1, :], 0.0)

    def y1():
        # Recomputed per phase from the re-streamed x tile (no VMEM slab).
        return jnp.dot(x_ref[...], w1_ref[...],
                       preferred_element_type=jnp.float32)

    # ---- phase 0: y1 = x @ w1 (no bias: it cancels in BN), gather stats ----
    @pl.when(p == 0)
    def _():
        accumulate(y1(), 0)

    # ---- phase 1: h1 = BN+ReLU(y1); y2 = h1 @ w2; gather stats ----
    @pl.when(p == 1)
    def _():
        @pl.when(i == 0)
        def _():
            finalize(0, g1_ref, be1_ref)
        h1 = bn_relu(y1(), 0)
        accumulate(matmul(h1, w2_ref), 1)

    # ---- phase 2: h2 = BN+ReLU(y2); out = h2 @ w3 + b3 ----
    @pl.when(p == 2)
    def _():
        @pl.when(i == 0)
        def _():
            if pad_rows:
                # Padded rows have y1 == 0, so each contributed exactly
                # relu(t1) @ w2 to the layer-2 stats; subtract analytically.
                corr = lambda: matmul(jnp.maximum(sh_ref[0:1, :], 0.0), w2_ref)
            else:
                corr = None
            finalize(1, g2_ref, be2_ref, corr)
        h1 = bn_relu(y1(), 0)
        h2 = bn_relu(matmul(h1, w2_ref), 1)
        o_ref[...] = (matmul(h2, w3_ref) + b3_ref[...]).astype(o_ref.dtype)


def mlp_forward(x, params, *, tile_n=512):
    """x: (N, input_dim) f32.  params: logical (unpadded) weights as produced
    by init_params.  Returns (N, output_dim) f32."""
    n, d_in = x.shape
    h_dim = params["w1"].shape[1]
    o_dim = params["w3"].shape[1]

    dp = _round_up(d_in, LANE)
    hp = _round_up(h_dim, LANE)
    op = _round_up(o_dim, LANE)

    tile_n = _round_up(max(tile_n, LANE), LANE)
    tile_n = min(tile_n, _round_up(n, LANE))       # don't over-pad small batches
    n_pad = _round_up(n, tile_n)
    n_tiles = n_pad // tile_n
    pad_rows = n_pad - n

    def pad2(a, rows, cols, dtype):
        return jnp.pad(a, ((0, rows - a.shape[0]),
                           (0, cols - a.shape[1]))).astype(dtype)

    xb = pad2(x, n_pad, dp, jnp.bfloat16)
    w1 = pad2(params["w1"], dp, hp, jnp.bfloat16)
    w2 = pad2(params["w2"], hp, hp, jnp.bfloat16)
    w3 = pad2(params["w3"], hp, op, jnp.bfloat16)
    b3 = pad2(params["b3"], 1, op, jnp.float32)
    g1 = pad2(params["g1"], 1, hp, jnp.float32)
    be1 = pad2(params["be1"], 1, hp, jnp.float32)
    g2 = pad2(params["g2"], 1, hp, jnp.float32)
    be2 = pad2(params["be2"], 1, hp, jnp.float32)

    const = lambda p, i: (0, 0)

    # Honest VMEM budget: 2x only on streamed tiles and the (default
    # double-buffered) resident operands; single-copy scratch; headroom for
    # compiler temporaries; clamped to the device capacity.
    vmem_bytes = (
        2 * tile_n * dp * 2                        # x tiles (bf16, 2 buffers)
        + 2 * tile_n * op * 4                      # out tiles (f32, 2 buffers)
        + 2 * (dp * hp + hp * hp + hp * op) * 2    # bf16 weights (2 buffers)
        + 2 * 8 * (op + 4 * hp) * 4                # (1, .) params, 8-sublane pad
        + 4 * 8 * hp * 4                           # stats/scale/shift scratch
    )
    vmem_bytes = int(vmem_bytes) + (8 << 20)
    try:
        vmem_cap = int(pltpu.get_tpu_info().vmem_capacity_bytes)
    except Exception:  # info query unavailable (e.g. interpret mode)
        vmem_cap = 64 << 20
    vmem_bytes = min(vmem_bytes, vmem_cap)

    kernel = functools.partial(_mlp3_kernel, n_true=n, pad_rows=pad_rows)

    out = pl.pallas_call(
        kernel,
        out_shape=jax.ShapeDtypeStruct((n_pad, op), jnp.float32),
        grid=(3, n_tiles),
        in_specs=[
            # x streams in every phase (it is re-used by the recompute).
            pl.BlockSpec((tile_n, dp), lambda p, i: (i, 0)),
            pl.BlockSpec((dp, hp), const),      # w1 (VMEM resident)
            pl.BlockSpec((hp, hp), const),      # w2 (VMEM resident)
            pl.BlockSpec((hp, op), const),      # w3 (VMEM resident)
            pl.BlockSpec((1, op), const),       # b3
            pl.BlockSpec((1, hp), const),       # gamma1
            pl.BlockSpec((1, hp), const),       # beta1
            pl.BlockSpec((1, hp), const),       # gamma2
            pl.BlockSpec((1, hp), const),       # beta2
        ],
        # out only streams during phase 2 (lane-dense 128-wide stores);
        # pinned to block 0 in phases 0/1 so no spurious writebacks occur.
        out_specs=pl.BlockSpec((tile_n, op),
                               lambda p, i: (jnp.where(p == 2, i, 0), 0)),
        scratch_shapes=[
            pltpu.VMEM((2, hp), jnp.float32),   # per-feature sum    [layer]
            pltpu.VMEM((2, hp), jnp.float32),   # per-feature sumsq  [layer]
            pltpu.VMEM((2, hp), jnp.float32),   # fused BN scale     [layer]
            pltpu.VMEM((2, hp), jnp.float32),   # fused BN shift     [layer]
        ],
        compiler_params=pltpu.CompilerParams(
            # Both axes carry the BN stats accumulator -> sequential.
            dimension_semantics=("arbitrary", "arbitrary"),
            vmem_limit_bytes=vmem_bytes,
        ),
    )(xb, w1, w2, w3, b3, g1, be1, g2, be2)

    return out[:n, :o_dim]


def init_params(key, input_dim, hidden_dim, output_dim):
    """PyTorch-like init: Linear weight/bias ~ U(+-1/sqrt(fan_in)); BN gamma=1,
    beta=0.  Weights stored transposed as (in, out); vectors as (1, dim).
    b1/b2 are kept for full PyTorch fidelity in the reference, but the kernel
    does not consume them (they cancel exactly against the BN mean)."""
    ks = jax.random.split(key, 6)

    def linear(kw, kb, fan_in, fan_out):
        bound = 1.0 / float(fan_in) ** 0.5
        w = jax.random.uniform(kw, (fan_in, fan_out), jnp.float32, -bound, bound)
        b = jax.random.uniform(kb, (1, fan_out), jnp.float32, -bound, bound)
        return w, b

    w1, b1 = linear(ks[0], ks[1], input_dim, hidden_dim)
    w2, b2 = linear(ks[2], ks[3], hidden_dim, hidden_dim)
    w3, b3 = linear(ks[4], ks[5], hidden_dim, output_dim)
    return {
        "w1": w1, "b1": b1,
        "g1": jnp.ones((1, hidden_dim), jnp.float32),
        "be1": jnp.zeros((1, hidden_dim), jnp.float32),
        "w2": w2, "b2": b2,
        "g2": jnp.ones((1, hidden_dim), jnp.float32),
        "be2": jnp.zeros((1, hidden_dim), jnp.float32),
        "w3": w3, "b3": b3,
    }


def mlp_reference(x, p):
    """Pure-JAX reference mirroring the PyTorch forward (training-mode BN),
    including the hidden-layer biases.  Matmuls use the same bf16-operand /
    f32-accumulate precision as the kernel."""
    def mm(a, w):
        return jnp.dot(a.astype(jnp.bfloat16), w.astype(jnp.bfloat16),
                       preferred_element_type=jnp.float32)

    def hidden(h, w, b, g, be):
        y = mm(h, w) + b
        mean = jnp.mean(y, axis=0, keepdims=True)
        var = jnp.mean((y - mean) ** 2, axis=0, keepdims=True)
        return jnp.maximum((y - mean) * jax.lax.rsqrt(var + BN_EPS) * g + be, 0.0)

    h = hidden(x, p["w1"], p["b1"], p["g1"], p["be1"])
    h = hidden(h, p["w2"], p["b2"], p["g2"], p["be2"])
    return mm(h, p["w3"]) + p["b3"]


if __name__ == "__main__":
    # MLP(n_layer=3, input_dim=16, hidden_dim=32, output_dim=8), batch N=200.
    N, INPUT_DIM, HIDDEN_DIM, OUTPUT_DIM = 200, 16, 32, 8

    key = jax.random.PRNGKey(0)
    kx, kp = jax.random.split(key)
    x = jax.random.normal(kx, (N, INPUT_DIM), jnp.float32)
    params = init_params(kp, INPUT_DIM, HIDDEN_DIM, OUTPUT_DIM)

    ref = mlp_reference(x, params)

    # Default tile (clamped to 256 rows here): single row tile + 56 padded
    # rows -> exercises the analytic padded-row stats correction.
    out = jax.block_until_ready(mlp_forward(x, params))
    assert out.shape == (N, OUTPUT_DIM)
    err = float(jnp.max(jnp.abs(out - ref)))
    assert jnp.allclose(out, ref, atol=1e-2, rtol=1e-2), f"max abs err {err}"

    # Small explicit tile -> 2 row tiles: exercises the cross-tile stats
    # accumulation and the streamed x / out pipeline.
    out2 = jax.block_until_ready(mlp_forward(x, params, tile_n=128))
    err2 = float(jnp.max(jnp.abs(out2 - ref)))
    assert jnp.allclose(out2, ref, atol=1e-2, rtol=1e-2), f"max abs err {err2}"

    print("KERNEL_OK")
</pallas_src>

<mosaic_0001>
module attributes {stable_mosaic.version = 11 : i64} {
  func.func @_mlp3_kernel(%arg0: i32, %arg1: i32, %arg2: memref<256x128xbf16, #tpu.memory_space<vmem>>, %arg3: memref<128x128xbf16, #tpu.memory_space<vmem>>, %arg4: memref<128x128xbf16, #tpu.memory_space<vmem>>, %arg5: memref<128x128xbf16, #tpu.memory_space<vmem>>, %arg6: memref<1x128xf32, #tpu.memory_space<vmem>>, %arg7: memref<1x128xf32, #tpu.memory_space<vmem>>, %arg8: memref<1x128xf32, #tpu.memory_space<vmem>>, %arg9: memref<1x128xf32, #tpu.memory_space<vmem>>, %arg10: memref<1x128xf32, #tpu.memory_space<vmem>>, %arg11: memref<256x128xf32, #tpu.memory_space<vmem>>, %arg12: memref<2x128xf32, #tpu.memory_space<vmem>>, %arg13: memref<2x128xf32, #tpu.memory_space<vmem>>, %arg14: memref<2x128xf32, #tpu.memory_space<vmem>>, %arg15: memref<2x128xf32, #tpu.memory_space<vmem>>) attributes {dimension_semantics = [#tpu.dimension_semantics<arbitrary>, #tpu.dimension_semantics<arbitrary>], iteration_bounds = array<i64: 3, 1>, scalar_prefetch = 0 : i64, scratch_operands = 4 : i64, tpu.core_type = #tpu.core_type<tc>, window_params = [{transform_indices = @transform_0, window_bounds = array<i64: 256, 128>}, {pipeline_mode = #tpu.pipeline_mode<synchronous>, transform_indices = @transform_1, window_bounds = array<i64: 128, 128>}, {pipeline_mode = #tpu.pipeline_mode<synchronous>, transform_indices = @transform_2, window_bounds = array<i64: 128, 128>}, {pipeline_mode = #tpu.pipeline_mode<synchronous>, transform_indices = @transform_3, window_bounds = array<i64: 128, 128>}, {pipeline_mode = #tpu.pipeline_mode<synchronous>, transform_indices = @transform_4, window_bounds = array<i64: 1, 128>}, {pipeline_mode = #tpu.pipeline_mode<synchronous>, transform_indices = @transform_5, window_bounds = array<i64: 1, 128>}, {pipeline_mode = #tpu.pipeline_mode<synchronous>, transform_indices = @transform_6, window_bounds = array<i64: 1, 128>}, {pipeline_mode = #tpu.pipeline_mode<synchronous>, transform_indices = @transform_7, window_bounds = array<i64: 1, 128>}, {pipeline_mode = #tpu.pipeline_mode<synchronous>, transform_indices = @transform_8, window_bounds = array<i64: 1, 128>}, {transform_indices = @transform_9, window_bounds = array<i64: 256, 128>}]} {
    %c0_i32 = arith.constant 0 : i32
    %0 = arith.cmpi eq, %arg0, %c0_i32 : i32
    %1 = arith.extui %0 : i1 to i32
    %c0_i32_0 = arith.constant 0 : i32
    %2 = arith.cmpi ne, %1, %c0_i32_0 : i32
    scf.if %2 {
      %c0 = arith.constant 0 : index
      %c0_3 = arith.constant 0 : index
      %9 = vector.load %arg2[%c0, %c0_3] : memref<256x128xbf16, #tpu.memory_space<vmem>>, vector<256x128xbf16>
      %c0_4 = arith.constant 0 : index
      %c0_5 = arith.constant 0 : index
      %10 = vector.load %arg3[%c0_4, %c0_5] : memref<128x128xbf16, #tpu.memory_space<vmem>>, vector<128x128xbf16>
      %cst = arith.constant dense<0.000000e+00> : vector<256x128xf32>
      %11 = tpu.matmul %9, %10, %cst {dimension_numbers = #tpu.dot_dimension_numbers<[1], [0], [0], [1], [0, 0, 1, 1], [], []>} : vector<256x128xbf16>, vector<128x128xbf16>, vector<256x128xf32> -> vector<256x128xf32>
      %c0_i32_6 = arith.constant 0 : i32
      %12 = arith.cmpi eq, %arg1, %c0_i32_6 : i32
      %13 = arith.extui %12 : i1 to i32
      %c0_i32_7 = arith.constant 0 : i32
      %14 = arith.cmpi ne, %13, %c0_i32_7 : i32
      scf.if %14 {
        %cst_18 = arith.constant 0.000000e+00 : f32
        %26 = vector.broadcast %cst_18 : f32 to vector<1x128xf32>
        %c0_19 = arith.constant 0 : index
        %c0_20 = arith.constant 0 : index
        %27 = vector.load %arg12[%c0_19, %c0_20] : memref<2x128xf32, #tpu.memory_space<vmem>>, vector<1x128xf32>
        tpu.vector_store %arg12[%c0_19, %c0_20], %26 {strides = array<i32>} : memref<2x128xf32, #tpu.memory_space<vmem>>, vector<1x128xf32>,
        %cst_21 = arith.constant 0.000000e+00 : f32
        %28 = vector.broadcast %cst_21 : f32 to vector<1x128xf32>
        %c0_22 = arith.constant 0 : index
        %c0_23 = arith.constant 0 : index
        %29 = vector.load %arg13[%c0_22, %c0_23] : memref<2x128xf32, #tpu.memory_space<vmem>>, vector<1x128xf32>
        tpu.vector_store %arg13[%c0_22, %c0_23], %28 {strides = array<i32>} : memref<2x128xf32, #tpu.memory_space<vmem>>, vector<1x128xf32>,
      } else {
      }
      %c0_8 = arith.constant 0 : index
      %c0_9 = arith.constant 0 : index
      %15 = vector.load %arg12[%c0_8, %c0_9] : memref<2x128xf32, #tpu.memory_space<vmem>>, vector<1x128xf32>
      %cst_10 = arith.constant dense<0.000000e+00> : vector<128xf32>
      %16 = vector.multi_reduction <add>, %11, %cst_10 [0] : vector<256x128xf32> to vector<128xf32>
      %17 = vector.shape_cast %16 : vector<128xf32> to vector<1x128xf32>
      %18 = arith.addf %15, %17 : vector<1x128xf32>
      %c0_11 = arith.constant 0 : index
      %c0_12 = arith.constant 0 : index
      %19 = vector.load %arg12[%c0_11, %c0_12] : memref<2x128xf32, #tpu.memory_space<vmem>>, vector<1x128xf32>
      tpu.vector_store %arg12[%c0_11, %c0_12], %18 {strides = array<i32>} : memref<2x128xf32, #tpu.memory_space<vmem>>, vector<1x128xf32>,
      %c0_13 = arith.constant 0 : index
      %c0_14 = arith.constant 0 : index
      %20 = vector.load %arg13[%c0_13, %c0_14] : memref<2x128xf32, #tpu.memory_space<vmem>>, vector<1x128xf32>
      %21 = arith.mulf %11, %11 : vector<256x128xf32>
      %cst_15 = arith.constant dense<0.000000e+00> : vector<128xf32>
      %22 = vector.multi_reduction <add>, %21, %cst_15 [0] : vector<256x128xf32> to vector<128xf32>
      %23 = vector.shape_cast %22 : vector<128xf32> to vector<1x128xf32>
      %24 = arith.addf %20, %23 : vector<1x128xf32>
      %c0_16 = arith.constant 0 : index
      %c0_17 = arith.constant 0 : index
      %25 = vector.load %arg13[%c0_16, %c0_17] : memref<2x128xf32, #tpu.memory_space<vmem>>, vector<1x128xf32>
      tpu.vector_store %arg13[%c0_16, %c0_17], %24 {strides = array<i32>} : memref<2x128xf32, #tpu.memory_space<vmem>>, vector<1x128xf32>,
    } else {
    }
    %c1_i32 = arith.constant 1 : i32
    %3 = arith.cmpi eq, %arg0, %c1_i32 : i32
    %4 = arith.extui %3 : i1 to i32
    %c0_i32_1 = arith.constant 0 : i32
    %5 = arith.cmpi ne, %4, %c0_i32_1 : i32
    scf.if %5 {
      %c0_i32_3 = arith.constant 0 : i32
      %9 = arith.cmpi eq, %arg1, %c0_i32_3 : i32
      %10 = arith.extui %9 : i1 to i32
      %c0_i32_4 = arith.constant 0 : i32
      %11 = arith.cmpi ne, %10, %c0_i32_4 : i32
      scf.if %11 {
        %c0_27 = arith.constant 0 : index
        %c0_28 = arith.constant 0 : index
        %40 = vector.load %arg12[%c0_27, %c0_28] : memref<2x128xf32, #tpu.memory_space<vmem>>, vector<1x128xf32>
        %c0_29 = arith.constant 0 : index
        %c0_30 = arith.constant 0 : index
        %41 = vector.load %arg13[%c0_29, %c0_30] : memref<2x128xf32, #tpu.memory_space<vmem>>, vector<1x128xf32>
        %cst_31 = arith.constant 5.000000e-03 : f32
        %42 = vector.broadcast %cst_31 : f32 to vector<1x128xf32>
        %43 = arith.mulf %40, %42 : vector<1x128xf32>
        %cst_32 = arith.constant 5.000000e-03 : f32
        %44 = vector.broadcast %cst_32 : f32 to vector<1x128xf32>
        %45 = arith.mulf %41, %44 : vector<1x128xf32>
        %46 = arith.mulf %43, %43 : vector<1x128xf32>
        %47 = arith.subf %45, %46 : vector<1x128xf32>
        %c0_33 = arith.constant 0 : index
        %c0_34 = arith.constant 0 : index
        %48 = vector.load %arg7[%c0_33, %c0_34] : memref<1x128xf32, #tpu.memory_space<vmem>>, vector<1x128xf32>
        %cst_35 = arith.constant 9.99999974E-6 : f32
        %49 = vector.broadcast %cst_35 : f32 to vector<1x128xf32>
        %50 = arith.addf %47, %49 : vector<1x128xf32>
        %51 = math.rsqrt %50 : vector<1x128xf32>
        %52 = arith.mulf %48, %51 : vector<1x128xf32>
        %c0_36 = arith.constant 0 : index
        %c0_37 = arith.constant 0 : index
        %53 = vector.load %arg14[%c0_36, %c0_37] : memref<2x128xf32, #tpu.memory_space<vmem>>, vector<1x128xf32>
        tpu.vector_store %arg14[%c0_36, %c0_37], %52 {strides = array<i32>} : memref<2x128xf32, #tpu.memory_space<vmem>>, vector<1x128xf32>,
        %c0_38 = arith.constant 0 : index
        %c0_39 = arith.constant 0 : index
        %54 = vector.load %arg8[%c0_38, %c0_39] : memref<1x128xf32, #tpu.memory_space<vmem>>, vector<1x128xf32>
        %55 = arith.mulf %43, %52 : vector<1x128xf32>
        %56 = arith.subf %54, %55 : vector<1x128xf32>
        %c0_40 = arith.constant 0 : index
        %c0_41 = arith.constant 0 : index
        %57 = vector.load %arg15[%c0_40, %c0_41] : memref<2x128xf32, #tpu.memory_space<vmem>>, vector<1x128xf32>
        tpu.vector_store %arg15[%c0_40, %c0_41], %56 {strides = array<i32>} : memref<2x128xf32, #tpu.memory_space<vmem>>, vector<1x128xf32>,
      } else {
      }
      %c0 = arith.constant 0 : index
      %c0_5 = arith.constant 0 : index
      %12 = vector.load %arg2[%c0, %c0_5] : memref<256x128xbf16, #tpu.memory_space<vmem>>, vector<256x128xbf16>
      %c0_6 = arith.constant 0 : index
      %c0_7 = arith.constant 0 : index
      %13 = vector.load %arg3[%c0_6, %c0_7] : memref<128x128xbf16, #tpu.memory_space<vmem>>, vector<128x128xbf16>
      %cst = arith.constant dense<0.000000e+00> : vector<256x128xf32>
      %14 = tpu.matmul %12, %13, %cst {dimension_numbers = #tpu.dot_dimension_numbers<[1], [0], [0], [1], [0, 0, 1, 1], [], []>} : vector<256x128xbf16>, vector<128x128xbf16>, vector<256x128xf32> -> vector<256x128xf32>
      %c0_8 = arith.constant 0 : index
      %c0_9 = arith.constant 0 : index
      %15 = vector.load %arg14[%c0_8, %c0_9] : memref<2x128xf32, #tpu.memory_space<vmem>>, vector<1x128xf32>
      %16 = vector.broadcast %15 : vector<1x128xf32> to vector<256x128xf32>
      %17 = arith.mulf %14, %16 : vector<256x128xf32>
      %c0_10 = arith.constant 0 : index
      %c0_11 = arith.constant 0 : index
      %18 = vector.load %arg15[%c0_10, %c0_11] : memref<2x128xf32, #tpu.memory_space<vmem>>, vector<1x128xf32>
      %19 = vector.broadcast %18 : vector<1x128xf32> to vector<256x128xf32>
      %20 = arith.addf %17, %19 : vector<256x128xf32>
      %cst_12 = arith.constant 0.000000e+00 : f32
      %21 = vector.broadcast %cst_12 : f32 to vector<256x128xf32>
      %22 = arith.maximumf %20, %21 : vector<256x128xf32>
      %23 = arith.truncf %22 : vector<256x128xf32> to vector<256x128xbf16>
      %c0_13 = arith.constant 0 : index
      %c0_14 = arith.constant 0 : index
      %24 = vector.load %arg4[%c0_13, %c0_14] : memref<128x128xbf16, #tpu.memory_space<vmem>>, vector<128x128xbf16>
      %cst_15 = arith.constant dense<0.000000e+00> : vector<256x128xf32>
      %25 = tpu.matmul %23, %24, %cst_15 {dimension_numbers = #tpu.dot_dimension_numbers<[1], [0], [0], [1], [0, 0, 1, 1], [], []>} : vector<256x128xbf16>, vector<128x128xbf16>, vector<256x128xf32> -> vector<256x128xf32>
      %c0_i32_16 = arith.constant 0 : i32
      %26 = arith.cmpi eq, %arg1, %c0_i32_16 : i32
      %27 = arith.extui %26 : i1 to i32
      %c0_i32_17 = arith.constant 0 : i32
      %28 = arith.cmpi ne, %27, %c0_i32_17 : i32
      scf.if %28 {
        %cst_27 = arith.constant 0.000000e+00 : f32
        %40 = vector.broadcast %cst_27 : f32 to vector<1x128xf32>
        %c1_28 = arith.constant 1 : index
        %c0_29 = arith.constant 0 : index
        %41 = vector.load %arg12[%c1_28, %c0_29] : memref<2x128xf32, #tpu.memory_space<vmem>>, vector<1x128xf32>
        tpu.vector_store %arg12[%c1_28, %c0_29], %40 {strides = array<i32>} : memref<2x128xf32, #tpu.memory_space<vmem>>, vector<1x128xf32>,
        %cst_30 = arith.constant 0.000000e+00 : f32
        %42 = vector.broadcast %cst_30 : f32 to vector<1x128xf32>
        %c1_31 = arith.constant 1 : index
        %c0_32 = arith.constant 0 : index
        %43 = vector.load %arg13[%c1_31, %c0_32] : memref<2x128xf32, #tpu.memory_space<vmem>>, vector<1x128xf32>
        tpu.vector_store %arg13[%c1_31, %c0_32], %42 {strides = array<i32>} : memref<2x128xf32, #tpu.memory_space<vmem>>, vector<1x128xf32>,
      } else {
      }
      %c1 = arith.constant 1 : index
      %c0_18 = arith.constant 0 : index
      %29 = vector.load %arg12[%c1, %c0_18] : memref<2x128xf32, #tpu.memory_space<vmem>>, vector<1x128xf32>
      %cst_19 = arith.constant dense<0.000000e+00> : vector<128xf32>
      %30 = vector.multi_reduction <add>, %25, %cst_19 [0] : vector<256x128xf32> to vector<128xf32>
      %31 = vector.shape_cast %30 : vector<128xf32> to vector<1x128xf32>
      %32 = arith.addf %29, %31 : vector<1x128xf32>
      %c1_20 = arith.constant 1 : index
      %c0_21 = arith.constant 0 : index
      %33 = vector.load %arg12[%c1_20, %c0_21] : memref<2x128xf32, #tpu.memory_space<vmem>>, vector<1x128xf32>
      tpu.vector_store %arg12[%c1_20, %c0_21], %32 {strides = array<i32>} : memref<2x128xf32, #tpu.memory_space<vmem>>, vector<1x128xf32>,
      %c1_22 = arith.constant 1 : index
      %c0_23 = arith.constant 0 : index
      %34 = vector.load %arg13[%c1_22, %c0_23] : memref<2x128xf32, #tpu.memory_space<vmem>>, vector<1x128xf32>
      %35 = arith.mulf %25, %25 : vector<256x128xf32>
      %cst_24 = arith.constant dense<0.000000e+00> : vector<128xf32>
      %36 = vector.multi_reduction <add>, %35, %cst_24 [0] : vector<256x128xf32> to vector<128xf32>
      %37 = vector.shape_cast %36 : vector<128xf32> to vector<1x128xf32>
      %38 = arith.addf %34, %37 : vector<1x128xf32>
      %c1_25 = arith.constant 1 : index
      %c0_26 = arith.constant 0 : index
      %39 = vector.load %arg13[%c1_25, %c0_26] : memref<2x128xf32, #tpu.memory_space<vmem>>, vector<1x128xf32>
      tpu.vector_store %arg13[%c1_25, %c0_26], %38 {strides = array<i32>} : memref<2x128xf32, #tpu.memory_space<vmem>>, vector<1x128xf32>,
    } else {
    }
    %c2_i32 = arith.constant 2 : i32
    %6 = arith.cmpi eq, %arg0, %c2_i32 : i32
    %7 = arith.extui %6 : i1 to i32
    %c0_i32_2 = arith.constant 0 : i32
    %8 = arith.cmpi ne, %7, %c0_i32_2 : i32
    scf.if %8 {
      %c0_i32_3 = arith.constant 0 : i32
      %9 = arith.cmpi eq, %arg1, %c0_i32_3 : i32
      %10 = arith.extui %9 : i1 to i32
      %c0_i32_4 = arith.constant 0 : i32
      %11 = arith.cmpi ne, %10, %c0_i32_4 : i32
      scf.if %11 {
        %c1_27 = arith.constant 1 : index
        %c0_28 = arith.constant 0 : index
        %41 = vector.load %arg12[%c1_27, %c0_28] : memref<2x128xf32, #tpu.memory_space<vmem>>, vector<1x128xf32>
        %c1_29 = arith.constant 1 : index
        %c0_30 = arith.constant 0 : index
        %42 = vector.load %arg13[%c1_29, %c0_30] : memref<2x128xf32, #tpu.memory_space<vmem>>, vector<1x128xf32>
        %c0_31 = arith.constant 0 : index
        %c0_32 = arith.constant 0 : index
        %43 = vector.load %arg15[%c0_31, %c0_32] : memref<2x128xf32, #tpu.memory_space<vmem>>, vector<1x128xf32>
        %cst_33 = arith.constant 0.000000e+00 : f32
        %44 = vector.broadcast %cst_33 : f32 to vector<1x128xf32>
        %45 = arith.maximumf %43, %44 : vector<1x128xf32>
        %46 = arith.truncf %45 : vector<1x128xf32> to vector<1x128xbf16>
        %c0_34 = arith.constant 0 : index
        %c0_35 = arith.constant 0 : index
        %47 = vector.load %arg4[%c0_34, %c0_35] : memref<128x128xbf16, #tpu.memory_space<vmem>>, vector<128x128xbf16>
        %cst_36 = arith.constant dense<0.000000e+00> : vector<1x128xf32>
        %48 = tpu.matmul %46, %47, %cst_36 {dimension_numbers = #tpu.dot_dimension_numbers<[1], [0], [0], [1], [0, 0, 1, 1], [], []>} : vector<1x128xbf16>, vector<128x128xbf16>, vector<1x128xf32> -> vector<1x128xf32>
        %cst_37 = arith.constant 5.600000e+01 : f32
        %49 = vector.broadcast %cst_37 : f32 to vector<1x128xf32>
        %50 = arith.mulf %49, %48 : vector<1x128xf32>
        %51 = arith.subf %41, %50 : vector<1x128xf32>
        %52 = arith.mulf %48, %48 : vector<1x128xf32>
        %cst_38 = arith.constant 5.600000e+01 : f32
        %53 = vector.broadcast %cst_38 : f32 to vector<1x128xf32>
        %54 = arith.mulf %53, %52 : vector<1x128xf32>
        %55 = arith.subf %42, %54 : vector<1x128xf32>
        %cst_39 = arith.constant 5.000000e-03 : f32
        %56 = vector.broadcast %cst_39 : f32 to vector<1x128xf32>
        %57 = arith.mulf %51, %56 : vector<1x128xf32>
        %cst_40 = arith.constant 5.000000e-03 : f32
        %58 = vector.broadcast %cst_40 : f32 to vector<1x128xf32>
        %59 = arith.mulf %55, %58 : vector<1x128xf32>
        %60 = arith.mulf %57, %57 : vector<1x128xf32>
        %61 = arith.subf %59, %60 : vector<1x128xf32>
        %c0_41 = arith.constant 0 : index
        %c0_42 = arith.constant 0 : index
        %62 = vector.load %arg9[%c0_41, %c0_42] : memref<1x128xf32, #tpu.memory_space<vmem>>, vector<1x128xf32>
        %cst_43 = arith.constant 9.99999974E-6 : f32
        %63 = vector.broadcast %cst_43 : f32 to vector<1x128xf32>
        %64 = arith.addf %61, %63 : vector<1x128xf32>
        %65 = math.rsqrt %64 : vector<1x128xf32>
        %66 = arith.mulf %62, %65 : vector<1x128xf32>
        %c1_44 = arith.constant 1 : index
        %c0_45 = arith.constant 0 : index
        %67 = vector.load %arg14[%c1_44, %c0_45] : memref<2x128xf32, #tpu.memory_space<vmem>>, vector<1x128xf32>
        tpu.vector_store %arg14[%c1_44, %c0_45], %66 {strides = array<i32>} : memref<2x128xf32, #tpu.memory_space<vmem>>, vector<1x128xf32>,
        %c0_46 = arith.constant 0 : index
        %c0_47 = arith.constant 0 : index
        %68 = vector.load %arg10[%c0_46, %c0_47] : memref<1x128xf32, #tpu.memory_space<vmem>>, vector<1x128xf32>
        %69 = arith.mulf %57, %66 : vector<1x128xf32>
        %70 = arith.subf %68, %69 : vector<1x128xf32>
        %c1_48 = arith.constant 1 : index
        %c0_49 = arith.constant 0 : index
        %71 = vector.load %arg15[%c1_48, %c0_49] : memref<2x128xf32, #tpu.memory_space<vmem>>, vector<1x128xf32>
        tpu.vector_store %arg15[%c1_48, %c0_49], %70 {strides = array<i32>} : memref<2x128xf32, #tpu.memory_space<vmem>>, vector<1x128xf32>,
      } else {
      }
      %c0 = arith.constant 0 : index
      %c0_5 = arith.constant 0 : index
      %12 = vector.load %arg2[%c0, %c0_5] : memref<256x128xbf16, #tpu.memory_space<vmem>>, vector<256x128xbf16>
      %c0_6 = arith.constant 0 : index
      %c0_7 = arith.constant 0 : index
      %13 = vector.load %arg3[%c0_6, %c0_7] : memref<128x128xbf16, #tpu.memory_space<vmem>>, vector<128x128xbf16>
      %cst = arith.constant dense<0.000000e+00> : vector<256x128xf32>
      %14 = tpu.matmul %12, %13, %cst {dimension_numbers = #tpu.dot_dimension_numbers<[1], [0], [0], [1], [0, 0, 1, 1], [], []>} : vector<256x128xbf16>, vector<128x128xbf16>, vector<256x128xf32> -> vector<256x128xf32>
      %c0_8 = arith.constant 0 : index
      %c0_9 = arith.constant 0 : index
      %15 = vector.load %arg14[%c0_8, %c0_9] : memref<2x128xf32, #tpu.memory_space<vmem>>, vector<1x128xf32>
      %16 = vector.broadcast %15 : vector<1x128xf32> to vector<256x128xf32>
      %17 = arith.mulf %14, %16 : vector<256x128xf32>
      %c0_10 = arith.constant 0 : index
      %c0_11 = arith.constant 0 : index
      %18 = vector.load %arg15[%c0_10, %c0_11] : memref<2x128xf32, #tpu.memory_space<vmem>>, vector<1x128xf32>
      %19 = vector.broadcast %18 : vector<1x128xf32> to vector<256x128xf32>
      %20 = arith.addf %17, %19 : vector<256x128xf32>
      %cst_12 = arith.constant 0.000000e+00 : f32
      %21 = vector.broadcast %cst_12 : f32 to vector<256x128xf32>
      %22 = arith.maximumf %20, %21 : vector<256x128xf32>
      %23 = arith.truncf %22 : vector<256x128xf32> to vector<256x128xbf16>
      %c0_13 = arith.constant 0 : index
      %c0_14 = arith.constant 0 : index
      %24 = vector.load %arg4[%c0_13, %c0_14] : memref<128x128xbf16, #tpu.memory_space<vmem>>, vector<128x128xbf16>
      %cst_15 = arith.constant dense<0.000000e+00> : vector<256x128xf32>
      %25 = tpu.matmul %23, %24, %cst_15 {dimension_numbers = #tpu.dot_dimension_numbers<[1], [0], [0], [1], [0, 0, 1, 1], [], []>} : vector<256x128xbf16>, vector<128x128xbf16>, vector<256x128xf32> -> vector<256x128xf32>
      %c1 = arith.constant 1 : index
      %c0_16 = arith.constant 0 : index
      %26 = vector.load %arg14[%c1, %c0_16] : memref<2x128xf32, #tpu.memory_space<vmem>>, vector<1x128xf32>
      %27 = vector.broadcast %26 : vector<1x128xf32> to vector<256x128xf32>
      %28 = arith.mulf %25, %27 : vector<256x128xf32>
      %c1_17 = arith.constant 1 : index
      %c0_18 = arith.constant 0 : index
      %29 = vector.load %arg15[%c1_17, %c0_18] : memref<2x128xf32, #tpu.memory_space<vmem>>, vector<1x128xf32>
      %30 = vector.broadcast %29 : vector<1x128xf32> to vector<256x128xf32>
      %31 = arith.addf %28, %30 : vector<256x128xf32>
      %cst_19 = arith.constant 0.000000e+00 : f32
      %32 = vector.broadcast %cst_19 : f32 to vector<256x128xf32>
      %33 = arith.maximumf %31, %32 : vector<256x128xf32>
      %34 = arith.truncf %33 : vector<256x128xf32> to vector<256x128xbf16>
      %c0_20 = arith.constant 0 : index
      %c0_21 = arith.constant 0 : index
      %35 = vector.load %arg5[%c0_20, %c0_21] : memref<128x128xbf16, #tpu.memory_space<vmem>>, vector<128x128xbf16>
      %cst_22 = arith.constant dense<0.000000e+00> : vector<256x128xf32>
      %36 = tpu.matmul %34, %35, %cst_22 {dimension_numbers = #tpu.dot_dimension_numbers<[1], [0], [0], [1], [0, 0, 1, 1], [], []>} : vector<256x128xbf16>, vector<128x128xbf16>, vector<256x128xf32> -> vector<256x128xf32>
      %c0_23 = arith.constant 0 : index
      %c0_24 = arith.constant 0 : index
      %37 = vector.load %arg6[%c0_23, %c0_24] : memref<1x128xf32, #tpu.memory_space<vmem>>, vector<1x128xf32>
      %38 = vector.broadcast %37 : vector<1x128xf32> to vector<256x128xf32>
      %39 = arith.addf %36, %38 : vector<256x128xf32>
      %c0_25 = arith.constant 0 : index
      %c0_26 = arith.constant 0 : index
      %40 = vector.load %arg11[%c0_25, %c0_26] : memref<256x128xf32, #tpu.memory_space<vmem>>, vector<256x128xf32>
      tpu.vector_store %arg11[%c0_25, %c0_26], %39 {strides = array<i32>} : memref<256x128xf32, #tpu.memory_space<vmem>>, vector<256x128xf32>,
    } else {
    }
    return
  }
  func.func @transform_0(%arg0: i32, %arg1: i32) -> (i32, i32) {
    %c0_i32 = arith.constant 0 : i32
    %c0_i32_0 = arith.constant 0 : i32
    return %arg1, %c0_i32 : i32, i32
  }
  func.func @transform_1(%arg0: i32, %arg1: i32) -> (i32, i32) {
    %c0_i32 = arith.constant 0 : i32
    %c0_i32_0 = arith.constant 0 : i32
    %c0_i32_1 = arith.constant 0 : i32
    return %c0_i32, %c0_i32_0 : i32, i32
  }
  func.func @transform_2(%arg0: i32, %arg1: i32) -> (i32, i32) {
    %c0_i32 = arith.constant 0 : i32
    %c0_i32_0 = arith.constant 0 : i32
    %c0_i32_1 = arith.constant 0 : i32
    return %c0_i32, %c0_i32_0 : i32, i32
  }
  func.func @transform_3(%arg0: i32, %arg1: i32) -> (i32, i32) {
    %c0_i32 = arith.constant 0 : i32
    %c0_i32_0 = arith.constant 0 : i32
    %c0_i32_1 = arith.constant 0 : i32
    return %c0_i32, %c0_i32_0 : i32, i32
  }
  func.func @transform_4(%arg0: i32, %arg1: i32) -> (i32, i32) {
    %c0_i32 = arith.constant 0 : i32
    %c0_i32_0 = arith.constant 0 : i32
    %c0_i32_1 = arith.constant 0 : i32
    return %c0_i32, %c0_i32_0 : i32, i32
  }
  func.func @transform_5(%arg0: i32, %arg1: i32) -> (i32, i32) {
    %c0_i32 = arith.constant 0 : i32
    %c0_i32_0 = arith.constant 0 : i32
    %c0_i32_1 = arith.constant 0 : i32
    return %c0_i32, %c0_i32_0 : i32, i32
  }
  func.func @transform_6(%arg0: i32, %arg1: i32) -> (i32, i32) {
    %c0_i32 = arith.constant 0 : i32
    %c0_i32_0 = arith.constant 0 : i32
    %c0_i32_1 = arith.constant 0 : i32
    return %c0_i32, %c0_i32_0 : i32, i32
  }
  func.func @transform_7(%arg0: i32, %arg1: i32) -> (i32, i32) {
    %c0_i32 = arith.constant 0 : i32
    %c0_i32_0 = arith.constant 0 : i32
    %c0_i32_1 = arith.constant 0 : i32
    return %c0_i32, %c0_i32_0 : i32, i32
  }
  func.func @transform_8(%arg0: i32, %arg1: i32) -> (i32, i32) {
    %c0_i32 = arith.constant 0 : i32
    %c0_i32_0 = arith.constant 0 : i32
    %c0_i32_1 = arith.constant 0 : i32
    return %c0_i32, %c0_i32_0 : i32, i32
  }
  func.func @transform_9(%arg0: i32, %arg1: i32) -> (i32, i32) {
    %c2_i32 = arith.constant 2 : i32
    %0 = arith.cmpi eq, %arg0, %c2_i32 : i32
    %c0_i32 = arith.constant 0 : i32
    %1 = arith.select %0, %arg1, %c0_i32 : i32
    %c0_i32_0 = arith.constant 0 : i32
    %c0_i32_1 = arith.constant 0 : i32
    return %1, %c0_i32_0 : i32, i32
  }
}

</mosaic_0001>

<bundles_post_ra>
// kernel: tpu_custom_call.1
= control target key start
LH: loop header
LB: loop body
LE: loop exit
PB: predicated region body
PF: predicated region fallthrough
CT: control target
= control target key end

     0   :  { %14 = vsyncpa [#allocation7], 0  ;;  %s4529_s0 = inlined_call_operand.hbm [shape: bf16[256,128], index: 0, kind: input, shape index: {}]   ;;  %s4530_s1 = inlined_call_operand.hbm [shape: bf16[128,128], index: 1, kind: input, shape index: {}]   ;;  %s4531_s2 = inlined_call_operand.hbm [shape: bf16[128,128], index: 2, kind: input, shape index: {}]   ;;  %s4532_s3 = inlined_call_operand.hbm [shape: bf16[128,128], index: 3, kind: input, shape index: {}]   ;;  %s4533_s4 = inlined_call_operand.vmem [shape: f32[1,128], index: 4, kind: input, shape index: {}]   ;;  %s4534_s5 = inlined_call_operand.vmem [shape: f32[1,128], index: 5, kind: input, shape index: {}]   ;;  %s4535_s6 = inlined_call_operand.vmem [shape: f32[1,128], index: 6, kind: input, shape index: {}]   ;;  %s4536_s7 = inlined_call_operand.vmem [shape: f32[1,128], index: 7, kind: input, shape index: {}]   ;;  %s4537_s8 = inlined_call_operand.vmem [shape: f32[1,128], index: 8, kind: input, shape index: {}]   ;;  %s4538_s9 = inlined_call_operand.hbm [shape: f32[256,128], index: 9, kind: output, shape index: {}]  }
   0x1   :  { %15 = vsyncpa [#allocation10], 0 }
   0x2   :  { %16 = vsyncpa [#allocation13], 0 }
   0x3   :  { %17 = vsyncpa [#allocation8], 0 }
   0x4   :  { %19 = vsyncpa [#allocation8 + $0x1], 0  ;;  %s4099_s30 = smov 0   ;;  %s4101_s10 = smov 0  }
   0x5   :  { %s4103_s11 = smov 0  }
   0x6 LB: > { %s3052_s12 = sadd.s32 4294967295, %s4034_s11   ;;  %s3053_s13 = sadd.s32 4294967294, %s4034_s11   ;;  %s4034_s11 = sphi %s4103_s11, %s25_s11   ;;  %s4030_s10 = sphi %s4101_s10, %s4545_s10   ;;  %s4026_s30 = sphi %s4099_s30, %s4544_s30  }
   0x7   : > { %p3054_p0 = scmp.ge.s32.totalorder %s4034_s11, 1  ;;  %p266_p1 = scmp.lt.s32.totalorder %s4034_s11, 4 }
   0x8   : > { %p4120_p2 = scmp.eq.s32.totalorder %s3052_s12, 0  ;;  %s4036_s16 = smov [#allocation9]  }
   0x9   : > { %p4124_p3 = pnand %p3054_p0, %p266_p1  ;;  %s294_s17 = sshll.u32 %s4036_s16, 4  ;;  %s295_s17 = int_to_ptr.vmem [resolvable:$true] %s294_s17 }
   0xa   : > { %s37_s19 = sadd.s32 1, %s4030_s10  ;;  %s3879_s21 = scalar_lea.vmem %s295_s17, 1024 }
   0xb   : > { %p3695_p4 = pneg %p4124_p3  ;;  %p4137_p6 = scmp.ge.s32.totalorder %s37_s19, 3 }
   0xc   : > { %p3880_p8 = scmp.ne.s32.totalorder %s295_s17, %s3879_s21  ;;  %p3887_p11 = scmp.lt.s32.totalorder %s295_s17, %s295_s17 }
   0xd   : > { %p4132_p5 = pnand %p4120_p2, %p3695_p4  ;;  %p3888_p12 = scmp.lt.s32.totalorder %s3879_s21, %s3879_s21 }
   0xf   : > { %p3870_p7 = pneg %p4132_p5  ;;  %p3889_p13 = por %p3888_p12, %p3887_p11 }
  0x11   : > { %p3882_p9 = pnand %p3880_p8, %p3870_p7 }
  0x13   : > { %p3883_p10 = pneg %p3882_p9 }
  0x15   : > { %p3890_p0 = pnand %p3889_p13, %p3883_p10 }
  0x17   : > { %3893 = shalt.err (!%p3890_p0)
}
  0x18   : > { %s4037_s22 = smov 64   ;;  %s4038_s23 = smov 4  }
  0x19   : > { %3701 = dma.hbm_to_vmem [thread:$0]  (!%p4132_p5), %s4530_s1, 1024, %s295_s17, [#allocation10], %s4037_s22, %s4037_s22, %s4038_s23  }
  0x1a   : > { %s4547_s19 = smov (%p4137_p6, %s37_s19), 0  ;;  %s4039_s26 = smov [#allocation6]  }
  0x1b   : > { %s281_s27 = sshll.u32 %s4039_s26, 4  ;;  %s4040_s28 = smov [#allocation11]   ;;  %s282_s27 = int_to_ptr.vmem [resolvable:$true] %s281_s27 }
  0x1c   : > { %s307_s29 = sshll.u32 %s4040_s28, 4  ;;  %s3905_s16 = scalar_lea.vmem %s282_s27, 2048  ;;  %s308_s29 = int_to_ptr.vmem [resolvable:$true] %s307_s29 }
  0x1d   : > { %p3906_p1 = scmp.ne.s32.totalorder %s282_s27, %s3905_s16  ;;  %p3913_p9 = scmp.lt.s32.totalorder %s282_s27, %s282_s27 }
  0x1e   : > { %p3914_p10 = scmp.lt.s32.totalorder %s3905_s16, %s3905_s16 }
  0x1f   : > { %p3908_p4 = pnand %p3906_p1, %p3870_p7 }
  0x20   : > { %p3915_p11 = por %p3914_p10, %p3913_p9 }
  0x21   : > { %p3909_p8 = pneg %p3908_p4 }
  0x23   : > { %p3916_p12 = pnand %p3915_p11, %p3909_p8 }
  0x25   : > { %3919 = shalt.err (!%p3916_p12)
}
  0x26   : > { %3698 = dma.hbm_to_vmem [thread:$0]  (!%p4132_p5), %s4529_s0, 2048, %s282_s27, [#allocation7], %s4037_s22, %s4037_s22, %s4038_s23  }
  0x27   : > { %s3931_s21 = scalar_lea.vmem %s308_s29, 1024  ;;  %p3939_p1 = scmp.lt.s32.totalorder %s308_s29, %s308_s29 }
  0x28   : > { %p3932_p6 = scmp.ne.s32.totalorder %s308_s29, %s3931_s21  ;;  %p3940_p4 = scmp.lt.s32.totalorder %s3931_s21, %s3931_s21 }
  0x2a   : > { %p3934_p13 = pnand %p3932_p6, %p3870_p7  ;;  %p3941_p8 = por %p3940_p4, %p3939_p1 }
  0x2c   : > { %p3935_p0 = pneg %p3934_p13 }
  0x2e   : > { %p3942_p9 = pnand %p3941_p8, %p3935_p0 }
  0x30   : > { %3945 = shalt.err (!%p3942_p9)
}
  0x31   : > { %3704 = dma.hbm_to_vmem [thread:$0]  (!%p4132_p5), %s4531_s2, 1024, %s308_s29, [#allocation10], %s4037_s22, %s4037_s22, %s4038_s23  }
  0x32   : > { %s4041_s26 = smov [#allocation12]  }
  0x33   : > { %s320_s27 = sshll.u32 %s4041_s26, 4  ;;  %s321_s27 = int_to_ptr.vmem [resolvable:$true] %s320_s27 }
  0x34   : > { %s3957_s28 = scalar_lea.vmem %s321_s27, 1024  ;;  %p3965_p6 = scmp.lt.s32.totalorder %s321_s27, %s321_s27 }
  0x35   : > { %p3958_p10 = scmp.ne.s32.totalorder %s321_s27, %s3957_s28  ;;  %p3966_p13 = scmp.lt.s32.totalorder %s3957_s28, %s3957_s28 }
  0x37   : > { %p3960_p11 = pnand %p3958_p10, %p3870_p7  ;;  %p3967_p0 = por %p3966_p13, %p3965_p6 }
  0x39   : > { %p3961_p12 = pneg %p3960_p11 }
  0x3b   : > { %p3968_p1 = pnand %p3967_p0, %p3961_p12 }
  0x3d   : > { %3971 = shalt.err (!%p3968_p1)
}
  0x3e   : > { %3707 = dma.hbm_to_vmem [thread:$0]  (!%p4132_p5), %s4532_s3, 1024, %s321_s27, [#allocation13], %s4037_s22, %s4037_s22, %s4038_s23  }
  0x3f   : > { %351 = sbr.rel (%p4124_p3) target bundleno = 1645 (0x66d), region = 56 }
  0x44   : > { %4009 = dma.done.wait (%p4120_p2), [#allocation7], 2048  }
  0x45   : > { %4011 = vsyncadd (%p4120_p2), [#allocation7], 4294965248 }
  0x46   : > { %4013 = dma.done.wait (%p4120_p2), [#allocation10], 2048  }
  0x47   : > { %4015 = vsyncadd (%p4120_p2), [#allocation10], 4294965248 }
  0x48   : > { %4017 = dma.done.wait (%p4120_p2), [#allocation13], 1024  }
  0x49   : > { %4019 = vsyncadd (%p4120_p2), [#allocation13], 4294966272  ;;  %p3064_p3 = scmp.ne.s32.totalorder %s4026_s30, 0 }
  0x4b   : > { %402 = sbr.rel (%p3064_p3) target bundleno = 391 (0x187), region = 76 }
  0x50   : > { %v3760_v0 = vld [vmem:[#allocation9 + $0x38] sm:$0xff]   ;;  %v3761_v1 = vld [vmem:[#allocation9 + $0x30] sm:$0xff]   ;;  %v3762_v2 = vld [vmem:[#allocation9 + $0x28] sm:$0xff]   ;;  %v4042_v24 = vmov 0.0  }
  0x51   : > { %3335 = vmatprep.subr.bf16.mxu0 %v3760_v0  ;;  %3643 = vmatprep.subr.bf16.mxu1 %v3760_v0  ;;  %v3763_v3 = vld [vmem:[#allocation9 + $0x20] sm:$0xff]   ;;  %v3764_v5 = vld [vmem:[#allocation9 + $0x18] sm:$0xff]   ;;  %v3765_v6 = vld [vmem:[#allocation9 + $0x10] sm:$0xff]   ;;  %760 = vst [vmem:[#allocation2] sm:$0x1] %v4042_v24 }
  0x52   : > { %3336 = vmatpush3.bf16.msra.mxu0 %v3760_v0  ;;  %3651 = vmatpush3.bf16.msra.mxu1 %v3760_v0  ;;  %v3768_v4 = vld [vmem:[#allocation6] sm:$0xff]   ;;  %v3766_v8 = vld [vmem:[#allocation9 + $0x8] sm:$0xff]   ;;  %v3770_v12 = vld [vmem:[#allocation6 + $0x10] sm:$0xff]   ;;  %761 = vst [vmem:[#allocation3] sm:$0x1] %v4042_v24 }
  0x53   : > { %3337 = vmatprep.subr.bf16.mxu0 %v3761_v1  ;;  %3644 = vmatprep.subr.bf16.mxu1 %v3761_v1  ;;  %v3776_v7 = vld [vmem:[#allocation6 + $0x40] sm:$0xff]   ;;  %v3769_v10 = vld [vmem:[#allocation6 + $0x8] sm:$0xff]   ;;  %v3778_v13 = vld [vmem:[#allocation6 + $0x50] sm:$0xff]  }
  0x54   : > { %3351 = vmatprep.mubr.bf16.mxu0 %v3768_v4  ;;  %3367 = vmatprep.mubr.bf16.mxu1 %v3776_v7  ;;  %v3767_v9 = vld [vmem:[#allocation9] sm:$0xff]   ;;  %v3777_v11 = vld [vmem:[#allocation6 + $0x48] sm:$0xff]   ;;  %v3771_v14 = vld [vmem:[#allocation6 + $0x18] sm:$0xff]  }
  0x55   : > { %v3779_v15 = vld [vmem:[#allocation6 + $0x58] sm:$0xff]   ;;  %v3772_v16 = vld [vmem:[#allocation6 + $0x20] sm:$0xff]   ;;  %v3773_v18 = vld [vmem:[#allocation6 + $0x28] sm:$0xff]  }
  0x56   : > { %3338 = vmatpush3.bf16.msra.mxu0 %v3761_v1  ;;  %3652 = vmatpush3.bf16.msra.mxu1 %v3761_v1  ;;  %v3780_v17 = vld [vmem:[#allocation6 + $0x60] sm:$0xff]   ;;  %v3781_v19 = vld [vmem:[#allocation6 + $0x68] sm:$0xff]   ;;  %v3774_v20 = vld [vmem:[#allocation6 + $0x30] sm:$0xff]  }
  0x57   : > { %3339 = vmatprep.subr.bf16.mxu0 %v3762_v2  ;;  %3645 = vmatprep.subr.bf16.mxu1 %v3762_v2  ;;  %v3782_v21 = vld [vmem:[#allocation6 + $0x70] sm:$0xff]   ;;  %v3775_v22 = vld [vmem:[#allocation6 + $0x38] sm:$0xff]  }
  0x58   : > { %v3783_v23 = vld [vmem:[#allocation6 + $0x78] sm:$0xff]  }
  0x5a   : > { %3340 = vmatpush3.bf16.msra.mxu0 %v3762_v2  ;;  %3653 = vmatpush3.bf16.msra.mxu1 %v3762_v2 }
  0x5b   : > { %3341 = vmatprep.subr.bf16.mxu0 %v3763_v3  ;;  %3646 = vmatprep.subr.bf16.mxu1 %v3763_v3 }
  0x5e   : > { %3342 = vmatpush3.bf16.msra.mxu0 %v3763_v3  ;;  %3654 = vmatpush3.bf16.msra.mxu1 %v3763_v3 }
  0x5f   : > { %3343 = vmatprep.subr.bf16.mxu0 %v3764_v5  ;;  %3647 = vmatprep.subr.bf16.mxu1 %v3764_v5 }
  0x62   : > { %3344 = vmatpush3.bf16.msra.mxu0 %v3764_v5  ;;  %3655 = vmatpush3.bf16.msra.mxu1 %v3764_v5 }
  0x63   : > { %3345 = vmatprep.subr.bf16.mxu0 %v3765_v6  ;;  %3648 = vmatprep.subr.bf16.mxu1 %v3765_v6 }
  0x66   : > { %3346 = vmatpush3.bf16.msra.mxu0 %v3765_v6  ;;  %3656 = vmatpush3.bf16.msra.mxu1 %v3765_v6 }
  0x67   : > { %3347 = vmatprep.subr.bf16.mxu0 %v3766_v8  ;;  %3649 = vmatprep.subr.bf16.mxu1 %v3766_v8 }
  0x6a   : > { %3348 = vmatpush3.bf16.msra.mxu0 %v3766_v8  ;;  %3657 = vmatpush3.bf16.msra.mxu1 %v3766_v8 }
  0x6b   : > { %3349 = vmatprep.subr.bf16.mxu0 %v3767_v9  ;;  %3650 = vmatprep.subr.bf16.mxu1 %v3767_v9 }
  0x6e   : > { %3350 = vmatpush3.bf16.msra.mxu0 %v3767_v9  ;;  %3658 = vmatpush3.bf16.msra.mxu1 %v3767_v9 }
  0x71   : > { %3352 = vmatmul.mubr.bf16.vlgmr.msra.gmra.mxu0 %v3769_v10  ;;  %3368 = vmatmul.mubr.bf16.vlgmr.msra.gmra.mxu1 %v3777_v11 }
  0x72   : > { %3355 = vmatprep.mubr.bf16.mxu0 %v3770_v12  ;;  %3371 = vmatprep.mubr.bf16.mxu1 %v3778_v13 }
  0x79   : > { %3356 = vmatmul.mubr.bf16.gmra.mxu0 %v3771_v14  ;;  %3372 = vmatmul.mubr.bf16.gmra.mxu1 %v3779_v15 }
  0x7a   : > { %3359 = vmatprep.mubr.bf16.mxu0 %v3772_v16  ;;  %3375 = vmatprep.mubr.bf16.mxu1 %v3780_v17 }
  0x81   : > { %3360 = vmatmul.mubr.bf16.gmra.mxu0 %v3773_v18  ;;  %3376 = vmatmul.mubr.bf16.gmra.mxu1 %v3781_v19 }
  0x82   : > { %3363 = vmatprep.mubr.bf16.mxu0 %v3774_v20  ;;  %3379 = vmatprep.mubr.bf16.mxu1 %v3782_v21 }
  0x89   : > { %3364 = vmatmul.mubr.bf16.gmra.mxu0 %v3775_v22  ;;  %3380 = vmatmul.mubr.bf16.gmra.mxu1 %v3783_v23 }
 0x131   : > { %v3353_v25 = vpop.f32.mrf.mxu0  ;;  %v4206_v26 = vpop.f32.mrf.mxu1 }
 0x132   : > { %v805_v36 = vmul.f32 %v3353_v25, %v3353_v25 }
 0x133   : > { %v629_v27 = vpop.f32.mrf.mxu0  ;;  %v4208_v29 = vpop.f32.mrf.mxu1 }
 0x134   : > { %v803_v31 = vmul.f32 %v629_v27, %v629_v27 }
 0x135   : > { %v3354_v28 = vpop.f32.mrf.mxu0  ;;  %v4210_v35 = vpop.f32.mrf.mxu1 }
 0x136   : > { %v806_v40 = vmul.f32 %v3354_v28, %v3354_v28 }
 0x137   : > { %v632_v30 = vpop.f32.mrf.mxu0  ;;  %v696_v44 = vpop.f32.mrf.mxu1 }
 0x138   : > { %v763_v32 = vadd.f32 %v632_v30, %v629_v27  ;;  %v804_v33 = vmul.f32 %v632_v30, %v632_v30 }
 0x139   : > { %v3357_v34 = vpop.f32.mrf.mxu0  ;;  %v4212_v53 = vpop.f32.mrf.mxu1 }
 0x13a   : > { %v764_v37 = vadd.f32 %v3353_v25, %v763_v32  ;;  %v835_v38 = vadd.f32 %v804_v33, %v803_v31  ;;  %v809_v54 = vmul.f32 %v3357_v34, %v3357_v34 }
 0x13b   : > { %v645_v39 = vpop.f32.mrf.mxu0  ;;  %v709_v62 = vpop.f32.mrf.mxu1 }
 0x13c   : > { %v836_v41 = vadd.f32 %v835_v38, %v805_v36  ;;  %v765_v42 = vadd.f32 %v3354_v28, %v764_v37  ;;  %v807_v46 = vmul.f32 %v645_v39, %v645_v39 }
 0x13d   : > { %v3358_v43 = vpop.f32.mrf.mxu0  ;;  %v3374_v7 = vpop.f32.mrf.mxu1 }
 0x13e   : > { %v766_v45 = vadd.f32 %v765_v42, %v645_v39  ;;  %v837_v47 = vadd.f32 %v836_v41, %v806_v40  ;;  %v810_v58 = vmul.f32 %v3358_v43, %v3358_v43  ;;  %v820_v39 = vmul.f32 %v696_v44, %v696_v44 }
 0x13f   : > { %v648_v48 = vpop.f32.mrf.mxu0  ;;  %v712_v16 = vpop.f32.mrf.mxu1  ;;  %v821_v42 = vmul.f32 %v4206_v26, %v4206_v26 }
 0x140   : > { %v838_v49 = vadd.f32 %v837_v47, %v807_v46  ;;  %v767_v50 = vadd.f32 %v766_v45, %v648_v48  ;;  %v808_v51 = vmul.f32 %v648_v48, %v648_v48  ;;  %v822_v46 = vmul.f32 %v4210_v35, %v4210_v35 }
 0x141   : > { %v3361_v52 = vpop.f32.mrf.mxu0  ;;  %v3377_v24 = vpop.f32.mrf.mxu1 }
 0x142   : > { %v768_v55 = vadd.f32 %v3357_v34, %v767_v50  ;;  %v839_v56 = vadd.f32 %v838_v49, %v808_v51  ;;  %v813_v8 = vmul.f32 %v3361_v52, %v3361_v52  ;;  %v819_v34 = vmul.f32 %v4208_v29, %v4208_v29 }
 0x143   : > { %v661_v57 = vpop.f32.mrf.mxu0  ;;  %v725_v33 = vpop.f32.mrf.mxu1  ;;  %v823_v51 = vmul.f32 %v709_v62, %v709_v62 }
 0x144   : > { %v840_v59 = vadd.f32 %v839_v56, %v809_v54  ;;  %v769_v60 = vadd.f32 %v3358_v43, %v768_v55  ;;  %v811_v0 = vmul.f32 %v661_v57, %v661_v57  ;;  %v824_v54 = vmul.f32 %v712_v16, %v712_v16 }
 0x145   : > { %v3362_v61 = vpop.f32.mrf.mxu0  ;;  %v3378_v41 = vpop.f32.mrf.mxu1  ;;  %v825_v56 = vmul.f32 %v4212_v53, %v4212_v53 }
 0x146   : > { %v770_v63 = vadd.f32 %v769_v60, %v661_v57  ;;  %v841_v1 = vadd.f32 %v840_v59, %v810_v58  ;;  %v814_v12 = vmul.f32 %v3362_v61, %v3362_v61  ;;  %v826_v58 = vmul.f32 %v3374_v7, %v3374_v7 }
 0x147   : > { %v664_v2 = vpop.f32.mrf.mxu0  ;;  %v728_v49 = vpop.f32.mrf.mxu1 }
 0x148   : > { %v842_v3 = vadd.f32 %v841_v1, %v811_v0  ;;  %v771_v4 = vadd.f32 %v770_v63, %v664_v2  ;;  %v812_v5 = vmul.f32 %v664_v2, %v664_v2  ;;  %v828_v2 = vmul.f32 %v728_v49, %v728_v49 }
 0x149   : > { %v3365_v6 = vpop.f32.mrf.mxu0  ;;  %v3381_v55 = vpop.f32.mrf.mxu1 }
 0x14a   : > { %v772_v9 = vadd.f32 %v3361_v52, %v771_v4  ;;  %v843_v10 = vadd.f32 %v842_v3, %v812_v5  ;;  %v817_v25 = vmul.f32 %v3365_v6, %v3365_v6  ;;  %v829_v4 = vmul.f32 %v3377_v24, %v3377_v24 }
 0x14b   : > { %v677_v11 = vpop.f32.mrf.mxu0 }
 0x14c   : > { %v844_v13 = vadd.f32 %v843_v10, %v813_v8  ;;  %v773_v14 = vadd.f32 %v3362_v61, %v772_v9  ;;  %v815_v18 = vmul.f32 %v677_v11, %v677_v11  ;;  %v741_v61 = vpop.f32.mrf.mxu1  ;;  %v830_v8 = vmul.f32 %v3378_v41, %v3378_v41 }
 0x14d   : > { %v3366_v15 = vpop.f32.mrf.mxu0 }
 0x14e   : > { %v774_v17 = vadd.f32 %v773_v14, %v677_v11  ;;  %v845_v19 = vadd.f32 %v844_v13, %v814_v12  ;;  %v818_v30 = vmul.f32 %v3366_v15, %v3366_v15  ;;  %v3382_v3 = vpop.f32.mrf.mxu1  ;;  %v831_v12 = vmul.f32 %v741_v61, %v741_v61 }
 0x14f   : > { %v680_v20 = vpop.f32.mrf.mxu0 }
 0x150   : > { %v846_v21 = vadd.f32 %v845_v19, %v815_v18  ;;  %v775_v22 = vadd.f32 %v774_v17, %v680_v20  ;;  %v816_v23 = vmul.f32 %v680_v20, %v680_v20  ;;  %v744_v11 = vpop.f32.mrf.mxu1  ;;  %v834_v19 = vmul.f32 %v3382_v3, %v3382_v3 }
 0x152   : > { %v776_v27 = vadd.f32 %v3365_v6, %v775_v22  ;;  %v847_v28 = vadd.f32 %v846_v21, %v816_v23 }
 0x154   : > { %v777_v31 = vadd.f32 %v3366_v15, %v776_v27  ;;  %v848_v32 = vadd.f32 %v847_v28, %v817_v25  ;;  %v832_v15 = vmul.f32 %v744_v11, %v744_v11 }
 0x156   : > { %v849_v36 = vadd.f32 %v848_v32, %v818_v30  ;;  %v778_v37 = vadd.f32 %v777_v31, %v4208_v29 }
 0x158   : > { %v779_v38 = vadd.f32 %v778_v37, %v696_v44  ;;  %v850_v40 = vadd.f32 %v849_v36, %v819_v34  ;;  %v762_v34 = vld [vmem:[#allocation2] sm:$0x1] }
 0x15a   : > { %v780_v43 = vadd.f32 %v4206_v26, %v779_v38  ;;  %v851_v45 = vadd.f32 %v850_v40, %v820_v39  ;;  %v802_v38 = vld [vmem:[#allocation3] sm:$0x1] }
 0x15c   : > { %v852_v47 = vadd.f32 %v851_v45, %v821_v42  ;;  %v781_v48 = vadd.f32 %v4210_v35, %v780_v43  ;;  %v827_v35 = vmul.f32 %v725_v33, %v725_v33 }
 0x15e   : > { %v782_v50 = vadd.f32 %v781_v48, %v709_v62  ;;  %v853_v29 = vadd.f32 %v852_v47, %v822_v46 }
 0x160   : > { %v854_v52 = vadd.f32 %v853_v29, %v823_v51  ;;  %v783_v44 = vadd.f32 %v782_v50, %v712_v16  ;;  %v833_v16 = vmul.f32 %v3381_v55, %v3381_v55 }
 0x162   : > { %v784_v26 = vadd.f32 %v4212_v53, %v783_v44  ;;  %v855_v57 = vadd.f32 %v854_v52, %v824_v54 }
 0x164   : > { %v856_v59 = vadd.f32 %v855_v57, %v825_v56  ;;  %v785_v60 = vadd.f32 %v3374_v7, %v784_v26 }
 0x166   : > { %v786_v63 = vadd.f32 %v785_v60, %v725_v33  ;;  %v857_v0 = vadd.f32 %v856_v59, %v826_v58 }
 0x168   : > { %v858_v1 = vadd.f32 %v857_v0, %v827_v35  ;;  %v787_v62 = vadd.f32 %v786_v63, %v728_v49 }
 0x16a   : > { %v788_v5 = vadd.f32 %v3377_v24, %v787_v62  ;;  %v859_v6 = vadd.f32 %v858_v1, %v828_v2 }
 0x16c   : > { %v860_v9 = vadd.f32 %v859_v6, %v829_v4  ;;  %v789_v10 = vadd.f32 %v3378_v41, %v788_v5 }
 0x16e   : > { %v790_v53 = vadd.f32 %v789_v10, %v741_v61  ;;  %v861_v13 = vadd.f32 %v860_v9, %v830_v8 }
 0x170   : > { %v862_v14 = vadd.f32 %v861_v13, %v831_v12  ;;  %v791_v7 = vadd.f32 %v790_v53, %v744_v11 }
 0x172   : > { %v792_v17 = vadd.f32 %v3381_v55, %v791_v7  ;;  %v863_v18 = vadd.f32 %v862_v14, %v832_v15 }
 0x174   : > { %v793_v20 = vadd.f32 %v3382_v3, %v792_v17  ;;  %v864_v21 = vadd.f32 %v863_v18, %v833_v16 }
 0x176   : > { %v794_v22 = vrot.slane %v793_v20, 4  ;;  %v865_v23 = vadd.f32 %v864_v21, %v834_v19 }
 0x178   : > { %v795_v24 = vadd.f32 %v794_v22, %v793_v20  ;;  %v866_v25 = vrot.slane %v865_v23, 4 }
 0x17a   : > { %v796_v27 = vrot.slane %v795_v24, 2  ;;  %v867_v28 = vadd.f32 %v866_v25, %v865_v23 }
 0x17c   : > { %v797_v30 = vadd.f32 %v796_v27, %v795_v24  ;;  %v868_v31 = vrot.slane %v867_v28, 2 }
 0x17e   : > { %v798_v32 = vrot.slane %v797_v30, 1  ;;  %v869_v33 = vadd.f32 %v868_v31, %v867_v28 }
 0x180   : > { %v799_v36 = vadd.f32 %v798_v32, %v797_v30  ;;  %v870_v37 = vrot.slane %v869_v33, 1 }
 0x182   : > { %v800_v39 = vadd.f32 %v799_v36, %v762_v34  ;;  %v871_v40 = vadd.f32 %v870_v37, %v869_v33 }
 0x184   : > { %801 = vst [vmem:[#allocation2] sm:$0x1] %v800_v39  ;;  %v872_v41 = vadd.f32 %v871_v40, %v802_v38 }
 0x186   : > { %873 = vst [vmem:[#allocation3] sm:$0x1] %v872_v41 }
 0x187 PF: > { %p3089_p2 = scmp.ne.s32.totalorder %s4026_s30, 1 }
 0x189   : > { %877 = sbr.rel (%p3089_p2) target bundleno = 917 (0x395), region = 84 }
 0x18e   : > { %v3784_v42 = vld [vmem:[#allocation9 + $0x38] sm:$0xff]   ;;  %v3785_v43 = vld [vmem:[#allocation9 + $0x30] sm:$0xff]   ;;  %v3786_v45 = vld [vmem:[#allocation9 + $0x28] sm:$0xff]  }
 0x18f   : > { %3383 = vmatprep.subr.bf16.mxu0 %v3784_v42  ;;  %v3787_v46 = vld [vmem:[#allocation9 + $0x20] sm:$0xff]   ;;  %v3788_v48 = vld [vmem:[#allocation9 + $0x18] sm:$0xff]   ;;  %v3789_v49 = vld [vmem:[#allocation9 + $0x10] sm:$0xff]  }
 0x190   : > { %3384 = vmatpush3.bf16.msra.mxu0 %v3784_v42  ;;  %v3792_v47 = vld [vmem:[#allocation6] sm:$0xff]   ;;  %v3790_v50 = vld [vmem:[#allocation9 + $0x8] sm:$0xff]   ;;  %v3808_v29 = vld [vmem:[#allocation11 + $0x38] sm:$0xff]  }
 0x191   : > { %3385 = vmatprep.subr.bf16.mxu0 %v3785_v43  ;;  %3399 = vmatprep.mubr.bf16.mxu0 %v3792_v47  ;;  %v3791_v51 = vld [vmem:[#allocation9] sm:$0xff]   ;;  %v3809_v52 = vld [vmem:[#allocation11 + $0x30] sm:$0xff]   ;;  %v3810_v44 = vld [vmem:[#allocation11 + $0x28] sm:$0xff]  }
 0x192   : > { %3431 = vmatprep.subr.bf16.mxu1 %v3808_v29  ;;  %v882_v54 = vld [vmem:[#allocation2] sm:$0x1]  ;;  %v883_v55 = vld [vmem:[#allocation3] sm:$0x1]  ;;  %v3793_v56 = vld [vmem:[#allocation6 + $0x8] sm:$0xff]  }
 0x193   : > { %3432 = vmatpush3.bf16.msra.mxu1 %v3808_v29  ;;  %v3794_v26 = vld [vmem:[#allocation6 + $0x10] sm:$0xff]   ;;  %v884_v57 = vmul.f32 0.005, %v882_v54  ;;  %v885_v58 = vmul.f32 0.005, %v883_v55  ;;  %v3811_v60 = vld [vmem:[#allocation11 + $0x20] sm:$0xff]  }
 0x194   : > { %3386 = vmatpush3.bf16.msra.mxu0 %v3785_v43  ;;  %3433 = vmatprep.subr.bf16.mxu1 %v3809_v52  ;;  %v3795_v35 = vld [vmem:[#allocation6 + $0x18] sm:$0xff]   ;;  %v3796_v0 = vld [vmem:[#allocation6 + $0x20] sm:$0xff]   ;;  %v3797_v1 = vld [vmem:[#allocation6 + $0x28] sm:$0xff]  }
 0x195   : > { %3387 = vmatprep.subr.bf16.mxu0 %v3786_v45  ;;  %v886_v59 = vmul.f32 %v884_v57, %v884_v57  ;;  %v3798_v62 = vld [vmem:[#allocation6 + $0x30] sm:$0xff]   ;;  %v888_v2 = vld [vmem:[%s4534_s5] sm:$0x1]  ;;  %v3800_v9 = vld [vmem:[#allocation6 + $0x40] sm:$0xff]  }
 0x196   : > { %v893_v5 = vld [vmem:[%s4535_s6] sm:$0x1]  ;;  %v3801_v11 = vld [vmem:[#allocation6 + $0x48] sm:$0xff]   ;;  %v3802_v53 = vld [vmem:[#allocation6 + $0x50] sm:$0xff]  }
 0x197   : > { %3434 = vmatpush3.bf16.msra.mxu1 %v3809_v52  ;;  %v887_v61 = vsub.f32 %v885_v58, %v886_v59  ;;  %v3799_v8 = vld [vmem:[#allocation6 + $0x38] sm:$0xff]   ;;  %v3804_v13 = vld [vmem:[#allocation6 + $0x60] sm:$0xff]   ;;  %v3805_v14 = vld [vmem:[#allocation6 + $0x68] sm:$0xff]  }
 0x198   : > { %3388 = vmatpush3.bf16.msra.mxu0 %v3786_v45  ;;  %3435 = vmatprep.subr.bf16.mxu1 %v3810_v44  ;;  %v3803_v12 = vld [vmem:[#allocation6 + $0x58] sm:$0xff]   ;;  %v3806_v7 = vld [vmem:[#allocation6 + $0x70] sm:$0xff]   ;;  %v3814_v18 = vld [vmem:[#allocation11 + $0x8] sm:$0xff]  }
 0x199   : > { %3389 = vmatprep.subr.bf16.mxu0 %v3787_v46  ;;  %v889_v63 = vadd.f32 1e-05, %v887_v61  ;;  %v3807_v15 = vld [vmem:[#allocation6 + $0x78] sm:$0xff]   ;;  %v3813_v17 = vld [vmem:[#allocation11 + $0x10] sm:$0xff]   ;;  %v3815_v19 = vld [vmem:[#allocation11] sm:$0xff]  }
 0x19a   : > { %v3812_v16 = vld [vmem:[#allocation11 + $0x18] sm:$0xff]  }
 0x19b   : > { %3436 = vmatpush3.bf16.msra.mxu1 %v3810_v44  ;;  %3816 = vrsqrt.f32 %v889_v63 }
 0x19c   : > { %3390 = vmatpush3.bf16.msra.mxu0 %v3787_v46  ;;  %3437 = vmatprep.subr.bf16.mxu1 %v3811_v60 }
 0x19d   : > { %3391 = vmatprep.subr.bf16.mxu0 %v3788_v48 }
 0x19f   : > { %3438 = vmatpush3.bf16.msra.mxu1 %v3811_v60 }
 0x1a0   : > { %3392 = vmatpush3.bf16.msra.mxu0 %v3788_v48  ;;  %3439 = vmatprep.subr.bf16.mxu1 %v3812_v16 }
 0x1a1   : > { %3393 = vmatprep.subr.bf16.mxu0 %v3789_v49 }
 0x1a3   : > { %3440 = vmatpush3.bf16.msra.mxu1 %v3812_v16 }
 0x1a4   : > { %3394 = vmatpush3.bf16.msra.mxu0 %v3789_v49  ;;  %3441 = vmatprep.subr.bf16.mxu1 %v3813_v17 }
 0x1a5   : > { %3395 = vmatprep.subr.bf16.mxu0 %v3790_v50 }
 0x1a7   : > { %3442 = vmatpush3.bf16.msra.mxu1 %v3813_v17 }
 0x1a8   : > { %3396 = vmatpush3.bf16.msra.mxu0 %v3790_v50  ;;  %v3817_v3 = vpop.eup %3816  ;;  %3443 = vmatprep.subr.bf16.mxu1 %v3814_v18 }
 0x1a9   : > { %3397 = vmatprep.subr.bf16.mxu0 %v3791_v51  ;;  %v891_v4 = vmul.f32 %v3817_v3, %v888_v2 }
 0x1ab   : > { %892 = vst [vmem:[#allocation4] sm:$0x1] %v891_v4  ;;  %v894_v6 = vmul.f32 %v891_v4, %v884_v57  ;;  %3444 = vmatpush3.bf16.msra.mxu1 %v3814_v18 }
 0x1ac   : > { %3398 = vmatpush3.bf16.msra.mxu0 %v3791_v51  ;;  %3445 = vmatprep.subr.bf16.mxu1 %v3815_v19 }
 0x1ad   : > { %v895_v10 = vsub.f32 %v893_v5, %v894_v6 }
 0x1af   : > { %3400 = vmatmul.mubr.bf16.vlgmr.msra.gmra.mxu0 %v3793_v56  ;;  %896 = vst [vmem:[#allocation5] sm:$0x1] %v895_v10  ;;  %3446 = vmatpush3.bf16.msra.mxu1 %v3815_v19 }
 0x1b0   : > { %3403 = vmatprep.mubr.bf16.mxu0 %v3794_v26 }
 0x1b2   : > { %v4233_v21 = vld [vmem:[#allocation4] ss:$0 sm:$0xff] }
 0x1b6   : > { %v4237_v27 = vld [vmem:[#allocation5] ss:$0 sm:$0xff] }
 0x1b7   : > { %3404 = vmatmul.mubr.bf16.gmra.mxu0 %v3795_v35 }
 0x1b8   : > { %3407 = vmatprep.mubr.bf16.mxu0 %v3796_v0 }
 0x1bf   : > { %3408 = vmatmul.mubr.bf16.gmra.mxu0 %v3797_v1 }
 0x1c0   : > { %3411 = vmatprep.mubr.bf16.mxu0 %v3798_v62 }
 0x1c7   : > { %3412 = vmatmul.mubr.bf16.gmra.mxu0 %v3799_v8 }
 0x1c8   : > { %3415 = vmatprep.mubr.bf16.mxu0 %v3800_v9 }
 0x1cf   : > { %3416 = vmatmul.mubr.bf16.gmra.mxu0 %v3801_v11 }
 0x1d0   : > { %3419 = vmatprep.mubr.bf16.mxu0 %v3802_v53 }
 0x1d7   : > { %3420 = vmatmul.mubr.bf16.gmra.mxu0 %v3803_v12 }
 0x1d8   : > { %3423 = vmatprep.mubr.bf16.mxu0 %v3804_v13 }
 0x1df   : > { %3424 = vmatmul.mubr.bf16.gmra.mxu0 %v3805_v14 }
 0x1e0   : > { %3427 = vmatprep.mubr.bf16.mxu0 %v3806_v7 }
 0x1e7   : > { %3428 = vmatmul.mubr.bf16.gmra.mxu0 %v3807_v15 }
 0x26f   : > { %v3401_v20 = vpop.f32.mrf.mxu0 }
 0x270   : > { %v1257_v24 = vmul.f32 %v3401_v20, %v4233_v21 }
 0x271   : > { %v1123_v22 = vpop.f32.mrf.mxu0 }
 0x272   : > { %v1255_v23 = vmul.f32 %v4233_v21, %v1123_v22  ;;  %v1294_v34 = vadd.f32 %v4237_v27, %v1257_v24 }
 0x273   : > { %v3402_v25 = vpop.f32.mrf.mxu0 }
 0x274   : > { %v1258_v28 = vmul.f32 %v3402_v25, %v4233_v21  ;;  %v1292_v33 = vadd.f32 %v4237_v27, %v1255_v23  ;;  %v1326_v43 = vmax.f32 %v1294_v34, 0.0 }
 0x275   : > { %v1126_v30 = vpop.f32.mrf.mxu0 }
 0x276   : > { %v1295_v31 = vadd.f32 %v4237_v27, %v1258_v28  ;;  %v1256_v32 = vmul.f32 %v4233_v21, %v1126_v30  ;;  %v1324_v41 = vmax.f32 %v1292_v33, 0.0 }
 0x277   : > { %v3405_v36 = vpop.f32.mrf.mxu0 }
 0x278   : > { %v1293_v37 = vadd.f32 %v4237_v27, %v1256_v32  ;;  %v1327_v38 = vmax.f32 %v1295_v31, 0.0  ;;  %v1261_v45 = vmul.f32 %v3405_v36, %v4233_v21 }
 0x279   : > { %v1139_v39 = vpop.f32.mrf.mxu0 }
 0x27a   : > { %v1259_v40 = vmul.f32 %v4233_v21, %v1139_v39  ;;  %v1325_v42 = vmax.f32 %v1293_v37, 0.0  ;;  %v1357_v50 = vpack.c.bf16 %v1327_v38, %v1326_v43  ;;  %v1298_v44 = vadd.f32 %v4237_v27, %v1261_v45 }
 0x27b   : > { %v3406_v46 = vpop.f32.mrf.mxu0 }
 0x27c   : > { %v1262_v47 = vmul.f32 %v3406_v46, %v4233_v21  ;;  %v1356_v48 = vpack.c.bf16 %v1325_v42, %v1324_v41  ;;  %v1296_v51 = vadd.f32 %v4237_v27, %v1259_v40  ;;  %v1330_v60 = vmax.f32 %v1298_v44, 0.0 }
 0x27d   : > { %v1142_v49 = vpop.f32.mrf.mxu0 }
 0x27e   : > { %v1299_v29 = vadd.f32 %v4237_v27, %v1262_v47  ;;  %v1260_v52 = vmul.f32 %v4233_v21, %v1142_v49  ;;  %3447 = vmatprep.mubr.bf16.mxu1 %v1356_v48  ;;  %v1328_v57 = vmax.f32 %v1296_v51, 0.0 }
 0x27f   : > { %v3409_v54 = vpop.f32.mrf.mxu0  ;;  %3448 = vmatmul.mubr.bf16.vlgmr.msra.gmra.mxu1 %v1357_v50 }
 0x280   : > { %v1297_v55 = vadd.f32 %v4237_v27, %v1260_v52  ;;  %v1331_v56 = vmax.f32 %v1299_v29, 0.0  ;;  %v1265_v61 = vmul.f32 %v3409_v54, %v4233_v21 }
 0x281   : > { %v1155_v26 = vpop.f32.mrf.mxu0 }
 0x282   : > { %v1329_v58 = vmax.f32 %v1297_v55, 0.0  ;;  %v1263_v59 = vmul.f32 %v4233_v21, %v1155_v26  ;;  %v1359_v62 = vpack.c.bf16 %v1331_v56, %v1330_v60  ;;  %v1302_v5 = vadd.f32 %v4237_v27, %v1265_v61 }
 0x283   : > { %v3410_v63 = vpop.f32.mrf.mxu0 }
 0x284   : > { %v1266_v35 = vmul.f32 %v3410_v63, %v4233_v21  ;;  %v1358_v0 = vpack.c.bf16 %v1329_v58, %v1328_v57  ;;  %v1300_v2 = vadd.f32 %v4237_v27, %v1263_v59  ;;  %v1334_v13 = vmax.f32 %v1302_v5, 0.0 }
 0x285   : > { %v1158_v1 = vpop.f32.mrf.mxu0 }
 0x286   : > { %v1303_v3 = vadd.f32 %v4237_v27, %v1266_v35  ;;  %v1264_v4 = vmul.f32 %v4233_v21, %v1158_v1  ;;  %3451 = vmatprep.mubr.bf16.mxu1 %v1358_v0  ;;  %v1332_v11 = vmax.f32 %v1300_v2, 0.0 }
 0x287   : > { %v3413_v6 = vpop.f32.mrf.mxu0  ;;  %3452 = vmatmul.mubr.bf16.gmra.mxu1 %v1359_v62 }
 0x288   : > { %v1301_v8 = vadd.f32 %v4237_v27, %v1264_v4  ;;  %v1335_v9 = vmax.f32 %v1303_v3, 0.0  ;;  %v1269_v14 = vmul.f32 %v3413_v6, %v4233_v21 }
 0x289   : > { %v1171_v10 = vpop.f32.mrf.mxu0 }
 0x28a   : > { %v1333_v53 = vmax.f32 %v1301_v8, 0.0  ;;  %v1267_v12 = vmul.f32 %v4233_v21, %v1171_v10  ;;  %v1361_v18 = vpack.c.bf16 %v1335_v9, %v1334_v13  ;;  %v1306_v23 = vadd.f32 %v4237_v27, %v1269_v14 }
 0x28b   : > { %v3414_v7 = vpop.f32.mrf.mxu0 }
 0x28c   : > { %v1270_v15 = vmul.f32 %v3414_v7, %v4233_v21  ;;  %v1360_v16 = vpack.c.bf16 %v1333_v53, %v1332_v11  ;;  %v1304_v19 = vadd.f32 %v4237_v27, %v1267_v12  ;;  %v1338_v34 = vmax.f32 %v1306_v23, 0.0 }
 0x28d   : > { %v1174_v17 = vpop.f32.mrf.mxu0 }
 0x28e   : > { %v1307_v20 = vadd.f32 %v4237_v27, %v1270_v15  ;;  %v1268_v22 = vmul.f32 %v4233_v21, %v1174_v17  ;;  %3455 = vmatprep.mubr.bf16.mxu1 %v1360_v16  ;;  %v1336_v31 = vmax.f32 %v1304_v19, 0.0 }
 0x28f   : > { %v3417_v24 = vpop.f32.mrf.mxu0  ;;  %3456 = vmatmul.mubr.bf16.gmra.mxu1 %v1361_v18 }
 0x290   : > { %v1305_v25 = vadd.f32 %v4237_v27, %v1268_v22  ;;  %v1339_v28 = vmax.f32 %v1307_v20, 0.0  ;;  %v1273_v36 = vmul.f32 %v3417_v24, %v4233_v21 }
 0x291   : > { %v1187_v30 = vpop.f32.mrf.mxu0 }
 0x292   : > { %v1337_v32 = vmax.f32 %v1305_v25, 0.0  ;;  %v1271_v33 = vmul.f32 %v4233_v21, %v1187_v30  ;;  %v1363_v41 = vpack.c.bf16 %v1339_v28, %v1338_v34  ;;  %v1310_v46 = vadd.f32 %v4237_v27, %v1273_v36 }
 0x293   : > { %v3418_v37 = vpop.f32.mrf.mxu0 }
 0x294   : > { %v1274_v38 = vmul.f32 %v3418_v37, %v4233_v21  ;;  %v1362_v39 = vpack.c.bf16 %v1337_v32, %v1336_v31  ;;  %v1308_v42 = vadd.f32 %v4237_v27, %v1271_v33  ;;  %v1342_v44 = vmax.f32 %v1310_v46, 0.0 }
 0x295   : > { %v1190_v40 = vpop.f32.mrf.mxu0  ;;  %v4043_v46 = vmov 0.0  }
 0x296   : > { %v1311_v43 = vadd.f32 %v4237_v27, %v1274_v38  ;;  %v1272_v45 = vmul.f32 %v4233_v21, %v1190_v40  ;;  %3459 = vmatprep.mubr.bf16.mxu1 %v1362_v39  ;;  %v1340_v51 = vmax.f32 %v1308_v42, 0.0  ;;  %1600 = vst [vmem:[#allocation2 + $0x1] sm:$0x1] %v4043_v46  ;;  %1601 = vst [vmem:[#allocation3 + $0x1] sm:$0x1] %v4043_v46 }
 0x297   : > { %v3421_v47 = vpop.f32.mrf.mxu0  ;;  %3460 = vmatmul.mubr.bf16.gmra.mxu1 %v1363_v41 }
 0x298   : > { %v1309_v48 = vadd.f32 %v4237_v27, %v1272_v45  ;;  %v1343_v49 = vmax.f32 %v1311_v43, 0.0  ;;  %v1277_v54 = vmul.f32 %v3421_v47, %v4233_v21 }
 0x299   : > { %v1203_v50 = vpop.f32.mrf.mxu0 }
 0x29a   : > { %v1341_v29 = vmax.f32 %v1309_v48, 0.0  ;;  %v1275_v52 = vmul.f32 %v4233_v21, %v1203_v50  ;;  %v1365_v58 = vpack.c.bf16 %v1343_v49, %v1342_v44  ;;  %v1314_v63 = vadd.f32 %v4237_v27, %v1277_v54 }
 0x29b   : > { %v3422_v55 = vpop.f32.mrf.mxu0 }
 0x29c   : > { %v1278_v56 = vmul.f32 %v3422_v55, %v4233_v21  ;;  %v1364_v26 = vpack.c.bf16 %v1341_v29, %v1340_v51  ;;  %v1312_v59 = vadd.f32 %v4237_v27, %v1275_v52  ;;  %v1346_v5 = vmax.f32 %v1314_v63, 0.0 }
 0x29d   : > { %v1206_v57 = vpop.f32.mrf.mxu0 }
 0x29e   : > { %v1315_v60 = vadd.f32 %v4237_v27, %v1278_v56  ;;  %v1276_v61 = vmul.f32 %v4233_v21, %v1206_v57  ;;  %3463 = vmatprep.mubr.bf16.mxu1 %v1364_v26  ;;  %v1344_v2 = vmax.f32 %v1312_v59, 0.0 }
 0x29f   : > { %v3425_v35 = vpop.f32.mrf.mxu0  ;;  %3464 = vmatmul.mubr.bf16.gmra.mxu1 %v1365_v58 }
 0x2a0   : > { %v1313_v0 = vadd.f32 %v4237_v27, %v1276_v61  ;;  %v1347_v1 = vmax.f32 %v1315_v60, 0.0  ;;  %v1281_v6 = vmul.f32 %v3425_v35, %v4233_v21 }
 0x2a1   : > { %v1219_v62 = vpop.f32.mrf.mxu0 }
 0x2a2   : > { %v1345_v3 = vmax.f32 %v1313_v0, 0.0  ;;  %v1279_v4 = vmul.f32 %v4233_v21, %v1219_v62  ;;  %v1367_v53 = vpack.c.bf16 %v1347_v1, %v1346_v5  ;;  %v1318_v7 = vadd.f32 %v4237_v27, %v1281_v6 }
 0x2a3   : > { %v3426_v8 = vpop.f32.mrf.mxu0 }
 0x2a4   : > { %v1282_v9 = vmul.f32 %v3426_v8, %v4233_v21  ;;  %v1366_v10 = vpack.c.bf16 %v1345_v3, %v1344_v2  ;;  %v1316_v12 = vadd.f32 %v4237_v27, %v1279_v4  ;;  %v1350_v23 = vmax.f32 %v1318_v7, 0.0 }
 0x2a5   : > { %v1222_v11 = vpop.f32.mrf.mxu0 }
 0x2a6   : > { %v1319_v13 = vadd.f32 %v4237_v27, %v1282_v9  ;;  %v1280_v14 = vmul.f32 %v4233_v21, %v1222_v11  ;;  %3467 = vmatprep.mubr.bf16.mxu1 %v1366_v10  ;;  %v1348_v19 = vmax.f32 %v1316_v12, 0.0 }
 0x2a7   : > { %v3429_v15 = vpop.f32.mrf.mxu0  ;;  %3468 = vmatmul.mubr.bf16.gmra.mxu1 %v1367_v53 }
 0x2a8   : > { %v1317_v16 = vadd.f32 %v4237_v27, %v1280_v14  ;;  %v1351_v17 = vmax.f32 %v1319_v13, 0.0  ;;  %v1285_v24 = vmul.f32 %v3429_v15, %v4233_v21 }
 0x2a9   : > { %v1235_v18 = vpop.f32.mrf.mxu0 }
 0x2aa   : > { %v1349_v20 = vmax.f32 %v1317_v16, 0.0  ;;  %v1283_v22 = vmul.f32 %v4233_v21, %v1235_v18  ;;  %v1369_v32 = vpack.c.bf16 %v1351_v17, %v1350_v23  ;;  %v1322_v37 = vadd.f32 %v4237_v27, %v1285_v24 }
 0x2ab   : > { %v3430_v25 = vpop.f32.mrf.mxu0 }
 0x2ac   : > { %v1286_v28 = vmul.f32 %v3430_v25, %v4233_v21  ;;  %v1368_v30 = vpack.c.bf16 %v1349_v20, %v1348_v19  ;;  %v1320_v33 = vadd.f32 %v4237_v27, %v1283_v22  ;;  %v1354_v42 = vmax.f32 %v1322_v37, 0.0 }
 0x2ad   : > { %v1238_v31 = vpop.f32.mrf.mxu0 }
 0x2ae   : > { %v1323_v34 = vadd.f32 %v4237_v27, %v1286_v28  ;;  %v1284_v36 = vmul.f32 %v4233_v21, %v1238_v31  ;;  %3471 = vmatprep.mubr.bf16.mxu1 %v1368_v30  ;;  %v1352_v40 = vmax.f32 %v1320_v33, 0.0 }
 0x2af   : > { %3472 = vmatmul.mubr.bf16.gmra.mxu1 %v1369_v32 }
 0x2b0   : > { %v1321_v38 = vadd.f32 %v4237_v27, %v1284_v36  ;;  %v1355_v39 = vmax.f32 %v1323_v34, 0.0 }
 0x2b2   : > { %v1353_v41 = vmax.f32 %v1321_v38, 0.0  ;;  %v1371_v45 = vpack.c.bf16 %v1355_v39, %v1354_v42 }
 0x2b4   : > { %v1370_v43 = vpack.c.bf16 %v1353_v41, %v1352_v40 }
 0x2b6   : > { %3475 = vmatprep.mubr.bf16.mxu1 %v1370_v43 }
 0x2b7   : > { %3476 = vmatmul.mubr.bf16.gmra.mxu1 %v1371_v45 }
 0x33f   : > { %v3449_v47 = vpop.f32.mrf.mxu1 }
 0x340   : > { %v1645_v27 = vmul.f32 %v3449_v47, %v3449_v47 }
 0x341   : > { %v1470_v48 = vpop.f32.mrf.mxu1 }
 0x342   : > { %v1643_v50 = vmul.f32 %v1470_v48, %v1470_v48 }
 0x343   : > { %v3450_v21 = vpop.f32.mrf.mxu1 }
 0x344   : > { %v1646_v56 = vmul.f32 %v3450_v21, %v3450_v21 }
 0x345   : > { %v1473_v49 = vpop.f32.mrf.mxu1 }
 0x346   : > { %v1603_v51 = vadd.f32 %v1473_v49, %v1470_v48  ;;  %v1644_v29 = vmul.f32 %v1473_v49, %v1473_v49 }
 0x347   : > { %v3453_v52 = vpop.f32.mrf.mxu1 }
 0x348   : > { %v1604_v44 = vadd.f32 %v3449_v47, %v1603_v51  ;;  %v1675_v54 = vadd.f32 %v1644_v29, %v1643_v50  ;;  %v1649_v2 = vmul.f32 %v3453_v52, %v3453_v52 }
 0x349   : > { %v1486_v55 = vpop.f32.mrf.mxu1 }
 0x34a   : > { %v1676_v26 = vadd.f32 %v1675_v54, %v1645_v27  ;;  %v1605_v57 = vadd.f32 %v3450_v21, %v1604_v44  ;;  %v1647_v60 = vmul.f32 %v1486_v55, %v1486_v55 }
 0x34b   : > { %v3454_v58 = vpop.f32.mrf.mxu1 }
 0x34c   : > { %v1606_v59 = vadd.f32 %v1605_v57, %v1486_v55  ;;  %v1677_v61 = vadd.f32 %v1676_v26, %v1646_v56  ;;  %v1650_v6 = vmul.f32 %v3454_v58, %v3454_v58 }
 0x34d   : > { %v1489_v63 = vpop.f32.mrf.mxu1 }
 0x34e   : > { %v1678_v35 = vadd.f32 %v1677_v61, %v1647_v60  ;;  %v1607_v0 = vadd.f32 %v1606_v59, %v1489_v63  ;;  %v1648_v1 = vmul.f32 %v1489_v63, %v1489_v63 }
 0x34f   : > { %v3457_v62 = vpop.f32.mrf.mxu1 }
 0x350   : > { %v1608_v3 = vadd.f32 %v3453_v52, %v1607_v0  ;;  %v1679_v4 = vadd.f32 %v1678_v35, %v1648_v1  ;;  %v1653_v17 = vmul.f32 %v3457_v62, %v3457_v62 }
 0x351   : > { %v1502_v5 = vpop.f32.mrf.mxu1 }
 0x352   : > { %v1680_v8 = vadd.f32 %v1679_v4, %v1649_v2  ;;  %v1609_v9 = vadd.f32 %v3454_v58, %v1608_v3  ;;  %v1651_v53 = vmul.f32 %v1502_v5, %v1502_v5 }
 0x353   : > { %v3458_v10 = vpop.f32.mrf.mxu1 }
 0x354   : > { %v1610_v11 = vadd.f32 %v1609_v9, %v1502_v5  ;;  %v1681_v12 = vadd.f32 %v1680_v8, %v1650_v6  ;;  %v1654_v22 = vmul.f32 %v3458_v10, %v3458_v10 }
 0x355   : > { %v1505_v13 = vpop.f32.mrf.mxu1 }
 0x356   : > { %v1682_v14 = vadd.f32 %v1681_v12, %v1651_v53  ;;  %v1611_v7 = vadd.f32 %v1610_v11, %v1505_v13  ;;  %v1652_v15 = vmul.f32 %v1505_v13, %v1505_v13 }
 0x357   : > { %v3461_v16 = vpop.f32.mrf.mxu1 }
 0x358   : > { %v1612_v18 = vadd.f32 %v3457_v62, %v1611_v7  ;;  %v1683_v19 = vadd.f32 %v1682_v14, %v1652_v15  ;;  %v1657_v38 = vmul.f32 %v3461_v16, %v3461_v16 }
 0x359   : > { %v1518_v20 = vpop.f32.mrf.mxu1 }
 0x35a   : > { %v1684_v23 = vadd.f32 %v1683_v19, %v1653_v17  ;;  %v1613_v24 = vadd.f32 %v3458_v10, %v1612_v18  ;;  %v1655_v30 = vmul.f32 %v1518_v20, %v1518_v20 }
 0x35b   : > { %v3462_v25 = vpop.f32.mrf.mxu1 }
 0x35c   : > { %v1614_v28 = vadd.f32 %v1613_v24, %v1518_v20  ;;  %v1685_v31 = vadd.f32 %v1684_v23, %v1654_v22  ;;  %v1658_v42 = vmul.f32 %v3462_v25, %v3462_v25 }
 0x35d   : > { %v1521_v32 = vpop.f32.mrf.mxu1 }
 0x35e   : > { %v1686_v33 = vadd.f32 %v1685_v31, %v1655_v30  ;;  %v1615_v34 = vadd.f32 %v1614_v28, %v1521_v32  ;;  %v1656_v36 = vmul.f32 %v1521_v32, %v1521_v32 }
 0x35f   : > { %v3465_v37 = vpop.f32.mrf.mxu1 }
 0x360   : > { %v1616_v39 = vadd.f32 %v3461_v16, %v1615_v34  ;;  %v1687_v40 = vadd.f32 %v1686_v33, %v1656_v36  ;;  %v1661_v27 = vmul.f32 %v3465_v37, %v3465_v37 }
 0x361   : > { %v1534_v41 = vpop.f32.mrf.mxu1 }
 0x362   : > { %v1688_v43 = vadd.f32 %v1687_v40, %v1657_v38  ;;  %v1617_v45 = vadd.f32 %v3462_v25, %v1616_v39  ;;  %v1659_v48 = vmul.f32 %v1534_v41, %v1534_v41 }
 0x363   : > { %v3466_v46 = vpop.f32.mrf.mxu1 }
 0x364   : > { %v1618_v47 = vadd.f32 %v1617_v45, %v1534_v41  ;;  %v1689_v21 = vadd.f32 %v1688_v43, %v1658_v42  ;;  %v1662_v56 = vmul.f32 %v3466_v46, %v3466_v46 }
 0x365   : > { %v1537_v49 = vpop.f32.mrf.mxu1 }
 0x366   : > { %v1690_v50 = vadd.f32 %v1689_v21, %v1659_v48  ;;  %v1619_v51 = vadd.f32 %v1618_v47, %v1537_v49  ;;  %v1660_v29 = vmul.f32 %v1537_v49, %v1537_v49 }
 0x367   : > { %v3469_v52 = vpop.f32.mrf.mxu1 }
 0x368   : > { %v1620_v44 = vadd.f32 %v3465_v37, %v1619_v51  ;;  %v1691_v54 = vadd.f32 %v1690_v50, %v1660_v29  ;;  %v1665_v2 = vmul.f32 %v3469_v52, %v3469_v52 }
 0x369   : > { %v1550_v55 = vpop.f32.mrf.mxu1 }
 0x36a   : > { %v1692_v26 = vadd.f32 %v1691_v54, %v1661_v27  ;;  %v1621_v57 = vadd.f32 %v3466_v46, %v1620_v44  ;;  %v1663_v60 = vmul.f32 %v1550_v55, %v1550_v55  ;;  %v1642_v54 = vld [vmem:[#allocation3 + $0x1] sm:$0x1] }
 0x36b   : > { %v3470_v58 = vpop.f32.mrf.mxu1 }
 0x36c   : > { %v1622_v59 = vadd.f32 %v1621_v57, %v1550_v55  ;;  %v1693_v61 = vadd.f32 %v1692_v26, %v1662_v56  ;;  %v1666_v6 = vmul.f32 %v3470_v58, %v3470_v58 }
 0x36d   : > { %v1553_v63 = vpop.f32.mrf.mxu1 }
 0x36e   : > { %v1694_v35 = vadd.f32 %v1693_v61, %v1663_v60  ;;  %v1623_v0 = vadd.f32 %v1622_v59, %v1553_v63  ;;  %v1664_v1 = vmul.f32 %v1553_v63, %v1553_v63 }
 0x36f   : > { %v3473_v62 = vpop.f32.mrf.mxu1 }
 0x370   : > { %v1624_v3 = vadd.f32 %v3469_v52, %v1623_v0  ;;  %v1695_v4 = vadd.f32 %v1694_v35, %v1664_v1  ;;  %v1669_v17 = vmul.f32 %v3473_v62, %v3473_v62  ;;  %v1602_v52 = vld [vmem:[#allocation2 + $0x1] sm:$0x1] }
 0x371   : > { %v1566_v5 = vpop.f32.mrf.mxu1 }
 0x372   : > { %v1696_v8 = vadd.f32 %v1695_v4, %v1665_v2  ;;  %v1625_v9 = vadd.f32 %v3470_v58, %v1624_v3  ;;  %v1667_v53 = vmul.f32 %v1566_v5, %v1566_v5 }
 0x373   : > { %v3474_v10 = vpop.f32.mrf.mxu1 }
 0x374   : > { %v1626_v11 = vadd.f32 %v1625_v9, %v1566_v5  ;;  %v1697_v12 = vadd.f32 %v1696_v8, %v1666_v6  ;;  %v1670_v22 = vmul.f32 %v3474_v10, %v3474_v10 }
 0x375   : > { %v1569_v13 = vpop.f32.mrf.mxu1 }
 0x376   : > { %v1698_v14 = vadd.f32 %v1697_v12, %v1667_v53  ;;  %v1627_v7 = vadd.f32 %v1626_v11, %v1569_v13  ;;  %v1668_v15 = vmul.f32 %v1569_v13, %v1569_v13 }
 0x377   : > { %v3477_v16 = vpop.f32.mrf.mxu1 }
 0x378   : > { %v1628_v18 = vadd.f32 %v3473_v62, %v1627_v7  ;;  %v1699_v19 = vadd.f32 %v1698_v14, %v1668_v15  ;;  %v1673_v37 = vmul.f32 %v3477_v16, %v3477_v16 }
 0x379   : > { %v1582_v20 = vpop.f32.mrf.mxu1 }
 0x37a   : > { %v1700_v23 = vadd.f32 %v1699_v19, %v1669_v17  ;;  %v1629_v24 = vadd.f32 %v3474_v10, %v1628_v18  ;;  %v1671_v30 = vmul.f32 %v1582_v20, %v1582_v20 }
 0x37b   : > { %v3478_v25 = vpop.f32.mrf.mxu1 }
 0x37c   : > { %v1630_v28 = vadd.f32 %v1629_v24, %v1582_v20  ;;  %v1701_v31 = vadd.f32 %v1700_v23, %v1670_v22  ;;  %v1674_v40 = vmul.f32 %v3478_v25, %v3478_v25 }
 0x37d   : > { %v1585_v32 = vpop.f32.mrf.mxu1 }
 0x37e   : > { %v1702_v33 = vadd.f32 %v1701_v31, %v1671_v30  ;;  %v1631_v34 = vadd.f32 %v1630_v28, %v1585_v32  ;;  %v1672_v36 = vmul.f32 %v1585_v32, %v1585_v32 }
 0x380   : > { %v1632_v38 = vadd.f32 %v3477_v16, %v1631_v34  ;;  %v1703_v39 = vadd.f32 %v1702_v33, %v1672_v36 }
 0x382   : > { %v1633_v41 = vadd.f32 %v3478_v25, %v1632_v38  ;;  %v1704_v42 = vadd.f32 %v1703_v39, %v1673_v37 }
 0x384   : > { %v1634_v43 = vrot.slane %v1633_v41, 4  ;;  %v1705_v45 = vadd.f32 %v1704_v42, %v1674_v40 }
 0x386   : > { %v1635_v46 = vadd.f32 %v1634_v43, %v1633_v41  ;;  %v1706_v47 = vrot.slane %v1705_v45, 4 }
 0x388   : > { %v1636_v48 = vrot.slane %v1635_v46, 2  ;;  %v1707_v21 = vadd.f32 %v1706_v47, %v1705_v45 }
 0x38a   : > { %v1637_v49 = vadd.f32 %v1636_v48, %v1635_v46  ;;  %v1708_v50 = vrot.slane %v1707_v21, 2 }
 0x38c   : > { %v1638_v51 = vrot.slane %v1637_v49, 1  ;;  %v1709_v29 = vadd.f32 %v1708_v50, %v1707_v21 }
 0x38e   : > { %v1639_v27 = vadd.f32 %v1638_v51, %v1637_v49  ;;  %v1710_v44 = vrot.slane %v1709_v29, 1 }
 0x390   : > { %v1640_v55 = vadd.f32 %v1639_v27, %v1602_v52  ;;  %v1711_v56 = vadd.f32 %v1710_v44, %v1709_v29 }
 0x392   : > { %1641 = vst [vmem:[#allocation2 + $0x1] sm:$0x1] %v1640_v55  ;;  %v1712_v26 = vadd.f32 %v1711_v56, %v1642_v54 }
 0x394   : > { %1713 = vst [vmem:[#allocation3 + $0x1] sm:$0x1] %v1712_v26 }
 0x395 PF: > { %p3124_p5 = scmp.ne.s32.totalorder %s4026_s30, 2 }
 0x397   : > { %1717 = sbr.rel (%p3124_p5) target bundleno = 1631 (0x65f), region = 96 }
 0x39c   : > { %v3818_v57 = vld [vmem:[#allocation9 + $0x38] sm:$0xff]   ;;  %v3819_v58 = vld [vmem:[#allocation9 + $0x30] sm:$0xff]   ;;  %v4044_v59 = vmov 0.0   ;;  %vm4045_vm0 = vmmov 0   ;;  %v3820_v60 = vld [vmem:[#allocation9 + $0x28] sm:$0xff]  }
 0x39d   : > { %3479 = vmatprep.subr.bf16.mxu0 %v4044_v59  ;;  %3499 = vmatprep.subr.bf16.mxu1 %v3818_v57  ;;  %v3821_v61 = vld [vmem:[#allocation9 + $0x20] sm:$0xff]   ;;  %v3822_v35 = vld [vmem:[#allocation9 + $0x18] sm:$0xff]   ;;  %v3823_v0 = vld [vmem:[#allocation9 + $0x10] sm:$0xff]  }
 0x39e   : > { %3495 = vmatprep.mubr.msk.bf16.mxu0 %vm4045_vm0, %v4044_v59  ;;  %3500 = vmatpush3.bf16.msra.mxu1 %v3818_v57  ;;  %v3826_v63 = vld [vmem:[#allocation6] sm:$0xff]   ;;  %v3824_v1 = vld [vmem:[#allocation9 + $0x8] sm:$0xff]   ;;  %v3842_v2 = vld [vmem:[#allocation11 + $0x38] sm:$0xff]  }
 0x39f   : > { %3501 = vmatprep.subr.bf16.mxu1 %v3819_v58  ;;  %3515 = vmatprep.mubr.bf16.mxu1 %v3826_v63  ;;  %v3825_v62 = vld [vmem:[#allocation9] sm:$0xff]   ;;  %v3843_v3 = vld [vmem:[#allocation11 + $0x30] sm:$0xff]   ;;  %v3827_v4 = vld [vmem:[#allocation6 + $0x8] sm:$0xff]  }
 0x3a0   : > { %3480 = vmatpush3.bf16.msra.mxu0 %v3842_v2  ;;  %v3844_v5 = vld [vmem:[#allocation11 + $0x28] sm:$0xff]   ;;  %v3828_v6 = vld [vmem:[#allocation6 + $0x10] sm:$0xff]   ;;  %v3845_v8 = vld [vmem:[#allocation11 + $0x20] sm:$0xff]  }
 0x3a1   : > { %3481 = vmatprep.subr.bf16.mxu0 %v4044_v59  ;;  %v3829_v9 = vld [vmem:[#allocation6 + $0x18] sm:$0xff]   ;;  %v3830_v11 = vld [vmem:[#allocation6 + $0x20] sm:$0xff]   ;;  %v3847_v53 = vld [vmem:[#allocation11 + $0x10] sm:$0xff]  }
 0x3a2   : > { %3502 = vmatpush3.bf16.msra.mxu1 %v3819_v58  ;;  %v3846_v10 = vld [vmem:[#allocation11 + $0x18] sm:$0xff]   ;;  %v3831_v12 = vld [vmem:[#allocation6 + $0x28] sm:$0xff]   ;;  %v3832_v7 = vld [vmem:[#allocation6 + $0x30] sm:$0xff]  }
 0x3a3   : > { %3503 = vmatprep.subr.bf16.mxu1 %v3820_v60  ;;  %v3848_v13 = vld [vmem:[#allocation11 + $0x8] sm:$0xff]   ;;  %v1724_v14 = vld [vmem:[#allocation5] sm:$0x1]  ;;  %v3849_v16 = vld [vmem:[#allocation11] sm:$0xff]  }
 0x3a4   : > { %3482 = vmatpush3.bf16.msra.mxu0 %v3843_v3  ;;  %v1725_v15 = vmax.f32 %v1724_v14, 0.0  ;;  %v3850_v17 = vld [vmem:[#allocation11 + $0x38] sm:$0xff]   ;;  %v3834_v20 = vld [vmem:[#allocation6 + $0x40] sm:$0xff]   ;;  %v3851_v22 = vld [vmem:[#allocation11 + $0x30] sm:$0xff]  }
 0x3a5   : > { %3483 = vmatprep.subr.bf16.mxu0 %v4044_v59  ;;  %v3833_v19 = vld [vmem:[#allocation6 + $0x38] sm:$0xff]   ;;  %v3852_v23 = vld [vmem:[#allocation11 + $0x28] sm:$0xff]   ;;  %v3836_v25 = vld [vmem:[#allocation6 + $0x50] sm:$0xff]  }
 0x3a6   : > { %3504 = vmatpush3.bf16.msra.mxu1 %v3820_v60  ;;  %v1726_v18 = vpack.c.bf16 %v1725_v15, %v1725_v15  ;;  %v3835_v24 = vld [vmem:[#allocation6 + $0x48] sm:$0xff]   ;;  %v3853_v28 = vld [vmem:[#allocation11 + $0x20] sm:$0xff]   ;;  %v3837_v30 = vld [vmem:[#allocation6 + $0x58] sm:$0xff]  }
 0x3a7   : > { %3505 = vmatprep.subr.bf16.mxu1 %v3821_v61  ;;  %v3838_v31 = vld [vmem:[#allocation6 + $0x60] sm:$0xff]   ;;  %v3839_v32 = vld [vmem:[#allocation6 + $0x68] sm:$0xff]   ;;  %v3840_v33 = vld [vmem:[#allocation6 + $0x70] sm:$0xff]  }
 0x3a8   : > { %3484 = vmatpush3.bf16.msra.mxu0 %v3844_v5  ;;  %v3841_v34 = vld [vmem:[#allocation6 + $0x78] sm:$0xff]   ;;  %v3855_v37 = vld [vmem:[#allocation11 + $0x10] sm:$0xff]   ;;  %v3856_v38 = vld [vmem:[#allocation11 + $0x8] sm:$0xff]  }
 0x3a9   : > { %3485 = vmatprep.subr.bf16.mxu0 %v4044_v59  ;;  %v3854_v36 = vld [vmem:[#allocation11 + $0x18] sm:$0xff]   ;;  %v3857_v39 = vld [vmem:[#allocation11] sm:$0xff]   ;;  %v3859_v41 = vld [vmem:[#allocation12 + $0x30] sm:$0xff]  }
 0x3aa   : > { %3506 = vmatpush3.bf16.msra.mxu1 %v3821_v61  ;;  %v3858_v40 = vld [vmem:[#allocation12 + $0x38] sm:$0xff]   ;;  %v4302_v42 = vld [vmem:[#allocation12 + $0x28] sm:$0xff]   ;;  %v4305_v43 = vld [vmem:[#allocation12 + $0x20] sm:$0xff]  }
 0x3ab   : > { %3507 = vmatprep.subr.bf16.mxu1 %v3822_v35  ;;  %v4309_v45 = vld [vmem:[#allocation12 + $0x18] sm:$0xff]  }
 0x3ac   : > { %3486 = vmatpush3.bf16.msra.mxu0 %v3845_v8  ;;  %v4314_v47 = vld [vmem:[#allocation4] ss:$0 sm:$0xff]  ;;  %v4318_v51 = vld [vmem:[#allocation5] ss:$0 sm:$0xff] }
 0x3ad   : > { %3487 = vmatprep.subr.bf16.mxu0 %v4044_v59 }
 0x3ae   : > { %3508 = vmatpush3.bf16.msra.mxu1 %v3822_v35 }
 0x3af   : > { %3509 = vmatprep.subr.bf16.mxu1 %v3823_v0 }
 0x3b0   : > { %3488 = vmatpush3.bf16.msra.mxu0 %v3846_v10 }
 0x3b1   : > { %3489 = vmatprep.subr.bf16.mxu0 %v4044_v59 }
 0x3b2   : > { %3510 = vmatpush3.bf16.msra.mxu1 %v3823_v0 }
 0x3b3   : > { %3511 = vmatprep.subr.bf16.mxu1 %v3824_v1 }
 0x3b4   : > { %3490 = vmatpush3.bf16.msra.mxu0 %v3847_v53 }
 0x3b5   : > { %3491 = vmatprep.subr.bf16.mxu0 %v4044_v59 }
 0x3b6   : > { %3512 = vmatpush3.bf16.msra.mxu1 %v3824_v1 }
 0x3b7   : > { %3513 = vmatprep.subr.bf16.mxu1 %v3825_v62 }
 0x3b8   : > { %3492 = vmatpush3.bf16.msra.mxu0 %v3848_v13 }
 0x3b9   : > { %3493 = vmatprep.subr.bf16.mxu0 %v4044_v59 }
 0x3ba   : > { %3514 = vmatpush3.bf16.msra.mxu1 %v3825_v62 }
 0x3bb   : > { %3659 = vmatprep.subr.bf16.mxu1 %v3858_v40 }
 0x3bc   : > { %3494 = vmatpush3.bf16.msra.mxu0 %v3849_v16 }
 0x3bd   : > { %3516 = vmatmul.mubr.bf16.vlgmr.msra.gmra.mxu1 %v3827_v4  ;;  %3547 = vmatprep.subr.bf16.mxu0 %v3850_v17 }
 0x3be   : > { %3519 = vmatprep.mubr.bf16.mxu1 %v3828_v6  ;;  %3667 = vmatpush3.bf16.msra.mxu1 %v3858_v40 }
 0x3bf   : > { %3496 = vmatmul.mubr.bf16.vlgmr.msra.gmra.mxu0 %v1726_v18  ;;  %3660 = vmatprep.subr.bf16.mxu1 %v3859_v41 }
 0x3c0   : > { %3548 = vmatpush3.bf16.msra.mxu0 %v3850_v17 }
 0x3c1   : > { %3549 = vmatprep.subr.bf16.mxu0 %v3851_v22 }
 0x3c2   : > { %3668 = vmatpush3.bf16.msra.mxu1 %v3859_v41 }
 0x3c3   : > { %3661 = vmatprep.subr.bf16.mxu1 %v4302_v42 }
 0x3c4   : > { %3550 = vmatpush3.bf16.msra.mxu0 %v3851_v22 }
 0x3c5   : > { %3520 = vmatmul.mubr.bf16.gmra.mxu1 %v3829_v9  ;;  %3551 = vmatprep.subr.bf16.mxu0 %v3852_v23 }
 0x3c6   : > { %3523 = vmatprep.mubr.bf16.mxu1 %v3830_v11  ;;  %3669 = vmatpush3.bf16.msra.mxu1 %v4302_v42 }
 0x3c7   : > { %3662 = vmatprep.subr.bf16.mxu1 %v4305_v43 }
 0x3c8   : > { %3552 = vmatpush3.bf16.msra.mxu0 %v3852_v23 }
 0x3c9   : > { %3553 = vmatprep.subr.bf16.mxu0 %v3853_v28 }
 0x3ca   : > { %3670 = vmatpush3.bf16.msra.mxu1 %v4305_v43 }
 0x3cb   : > { %3663 = vmatprep.subr.bf16.mxu1 %v4309_v45 }
 0x3cc   : > { %3554 = vmatpush3.bf16.msra.mxu0 %v3853_v28 }
 0x3cd   : > { %3524 = vmatmul.mubr.bf16.gmra.mxu1 %v3831_v12  ;;  %3555 = vmatprep.subr.bf16.mxu0 %v3854_v36 }
 0x3ce   : > { %3527 = vmatprep.mubr.bf16.mxu1 %v3832_v7  ;;  %3671 = vmatpush3.bf16.msra.mxu1 %v4309_v45 }
 0x3d0   : > { %3556 = vmatpush3.bf16.msra.mxu0 %v3854_v36  ;;  %v1723_v36 = vld [vmem:[#allocation3 + $0x1] sm:$0x1] }
 0x3d1   : > { %3557 = vmatprep.subr.bf16.mxu0 %v3855_v37 }
 0x3d4   : > { %3558 = vmatpush3.bf16.msra.mxu0 %v3855_v37 }
 0x3d5   : > { %3528 = vmatmul.mubr.bf16.gmra.mxu1 %v3833_v19  ;;  %3559 = vmatprep.subr.bf16.mxu0 %v3856_v38 }
 0x3d6   : > { %3531 = vmatprep.mubr.bf16.mxu1 %v3834_v20 }
 0x3d8   : > { %3560 = vmatpush3.bf16.msra.mxu0 %v3856_v38 }
 0x3d9   : > { %3561 = vmatprep.subr.bf16.mxu0 %v3857_v39 }
 0x3dc   : > { %3562 = vmatpush3.bf16.msra.mxu0 %v3857_v39 }
 0x3dd   : > { %3532 = vmatmul.mubr.bf16.gmra.mxu1 %v3835_v24  ;;  %3595 = vmatprep.subr.bf16.mxu0 %v3858_v40 }
 0x3de   : > { %3535 = vmatprep.mubr.bf16.mxu1 %v3836_v25  ;;  %v1722_v25 = vld [vmem:[#allocation2 + $0x1] sm:$0x1] }
 0x3e5   : > { %3536 = vmatmul.mubr.bf16.gmra.mxu1 %v3837_v30 }
 0x3e6   : > { %3539 = vmatprep.mubr.bf16.mxu1 %v3838_v31 }
 0x3ed   : > { %3540 = vmatmul.mubr.bf16.gmra.mxu1 %v3839_v32 }
 0x3ee   : > { %3543 = vmatprep.mubr.bf16.mxu1 %v3840_v33 }
 0x3f5   : > { %3544 = vmatmul.mubr.bf16.gmra.mxu1 %v3841_v34 }
 0x47d   : > { %v3517_v46 = vpop.f32.mrf.mxu1 }
 0x47e   : > { %v2209_v49 = vmul.f32 %v3517_v46, %v4314_v47 }
 0x47f   : > { %v2075_v48 = vpop.f32.mrf.mxu1  ;;  %v1825_v28 = vpop.f32.mrf.mxu0 }
 0x480   : > { %v2207_v21 = vmul.f32 %v4314_v47, %v2075_v48  ;;  %v2246_v55 = vadd.f32 %v4318_v51, %v2209_v49  ;;  %v1831_v32 = vmul.f32 56.0, %v1825_v28  ;;  %v1833_v33 = vmul.f32 %v1825_v28, %v1825_v28 }
 0x481   : > { %v3518_v50 = vpop.f32.mrf.mxu1  ;;  %v3497_v37 = vpop.f32.mrf.mxu0 }
 0x482   : > { %v2210_v29 = vmul.f32 %v3518_v50, %v4314_v47  ;;  %v2244_v27 = vadd.f32 %v4318_v51, %v2207_v21  ;;  %v2278_v63 = vmax.f32 %v2246_v55, 0.0  ;;  %v1840_v37 = vld [vmem:[%s4536_s7] sm:$0x1] }
 0x483   : > { %v2078_v52 = vpop.f32.mrf.mxu1  ;;  %v1828_v49 = vpop.f32.mrf.mxu0 }
 0x484   : > { %v2247_v44 = vadd.f32 %v4318_v51, %v2210_v29  ;;  %v2208_v54 = vmul.f32 %v4314_v47, %v2078_v52  ;;  %v2276_v59 = vmax.f32 %v2244_v27, 0.0 }
 0x485   : > { %v3521_v56 = vpop.f32.mrf.mxu1  ;;  %v3498_v55 = vpop.f32.mrf.mxu0 }
 0x486   : > { %v2245_v26 = vadd.f32 %v4318_v51, %v2208_v54  ;;  %v2279_v57 = vmax.f32 %v2247_v44, 0.0  ;;  %v2213_v35 = vmul.f32 %v3521_v56, %v4314_v47 }
 0x487   : > { %v2091_v58 = vpop.f32.mrf.mxu1 }
 0x488   : > { %v2277_v60 = vmax.f32 %v2245_v26, 0.0  ;;  %v2211_v61 = vmul.f32 %v4314_v47, %v2091_v58  ;;  %v2309_v2 = vpack.c.bf16 %v2279_v57, %v2278_v63  ;;  %v2250_v8 = vadd.f32 %v4318_v51, %v2213_v35 }
 0x489   : > { %v3522_v0 = vpop.f32.mrf.mxu1 }
 0x48a   : > { %v2214_v1 = vmul.f32 %v3522_v0, %v4314_v47  ;;  %v2308_v62 = vpack.c.bf16 %v2277_v60, %v2276_v59  ;;  %v2248_v4 = vadd.f32 %v4318_v51, %v2211_v61  ;;  %v2282_v7 = vmax.f32 %v2250_v8, 0.0 }
 0x48b   : > { %v2094_v3 = vpop.f32.mrf.mxu1 }
 0x48c   : > { %v2251_v5 = vadd.f32 %v4318_v51, %v2214_v1  ;;  %v2212_v6 = vmul.f32 %v4314_v47, %v2094_v3  ;;  %3563 = vmatprep.mubr.bf16.mxu0 %v2308_v62  ;;  %v2280_v12 = vmax.f32 %v2248_v4, 0.0 }
 0x48d   : > { %v3525_v9 = vpop.f32.mrf.mxu1  ;;  %3564 = vmatmul.mubr.bf16.vlgmr.msra.gmra.mxu0 %v2309_v2 }
 0x48e   : > { %v2249_v10 = vadd.f32 %v4318_v51, %v2212_v6  ;;  %3596 = vmatpush3.bf16.msra.mxu0 %v3858_v40  ;;  %v2283_v11 = vmax.f32 %v2251_v5, 0.0  ;;  %v2217_v15 = vmul.f32 %v3525_v9, %v4314_v47  ;;  %v1832_v40 = vsub.f32 %v1722_v25, %v1831_v32 }
 0x48f   : > { %v2107_v53 = vpop.f32.mrf.mxu1  ;;  %3597 = vmatprep.subr.bf16.mxu0 %v3859_v41 }
 0x490   : > { %v2281_v13 = vmax.f32 %v2249_v10, 0.0  ;;  %v2215_v14 = vmul.f32 %v4314_v47, %v2107_v53  ;;  %v2311_v20 = vpack.c.bf16 %v2283_v11, %v2282_v7  ;;  %v2254_v30 = vadd.f32 %v4318_v51, %v2217_v15 }
 0x491   : > { %v3526_v16 = vpop.f32.mrf.mxu1  ;;  %v4347_v44 = vmul.f32 0.005, %v1832_v40 }
 0x492   : > { %v2218_v17 = vmul.f32 %v3526_v16, %v4314_v47  ;;  %v2310_v18 = vpack.c.bf16 %v2281_v13, %v2280_v12  ;;  %3598 = vmatpush3.bf16.msra.mxu0 %v3859_v41  ;;  %v2252_v22 = vadd.f32 %v4318_v51, %v2215_v14  ;;  %v1834_v41 = vmul.f32 56.0, %v1833_v33 }
 0x493   : > { %v2110_v19 = vpop.f32.mrf.mxu1  ;;  %3599 = vmatprep.subr.bf16.mxu0 %v4302_v42  ;;  %v2286_v50 = vmax.f32 %v2254_v30, 0.0  ;;  %v1838_v58 = vmul.f32 %v4347_v44, %v4347_v44 }
 0x494   : > { %v2255_v23 = vadd.f32 %v4318_v51, %v2218_v17  ;;  %v2216_v24 = vmul.f32 %v4314_v47, %v2110_v19  ;;  %3567 = vmatprep.mubr.bf16.mxu0 %v2310_v18  ;;  %v2284_v46 = vmax.f32 %v2252_v22, 0.0  ;;  %v1835_v27 = vsub.f32 %v1723_v36, %v1834_v41 }
 0x495   : > { %v3529_v31 = vpop.f32.mrf.mxu1  ;;  %3568 = vmatmul.mubr.bf16.gmra.mxu0 %v2311_v20 }
 0x496   : > { %v2253_v34 = vadd.f32 %v4318_v51, %v2216_v24  ;;  %3600 = vmatpush3.bf16.msra.mxu0 %v4302_v42  ;;  %v2287_v38 = vmax.f32 %v2255_v23, 0.0  ;;  %v2221_v29 = vmul.f32 %v3529_v31, %v4314_v47  ;;  %v1837_v57 = vmul.f32 0.005, %v1835_v27 }
 0x497   : > { %v2123_v39 = vpop.f32.mrf.mxu1  ;;  %3601 = vmatprep.subr.bf16.mxu0 %v4305_v43 }
 0x498   : > { %v2285_v48 = vmax.f32 %v2253_v34, 0.0  ;;  %v2219_v21 = vmul.f32 %v4314_v47, %v2123_v39  ;;  %v2313_v26 = vpack.c.bf16 %v2287_v38, %v2286_v50  ;;  %v2258_v63 = vadd.f32 %v4318_v51, %v2221_v29 }
 0x499   : > { %v3530_v52 = vpop.f32.mrf.mxu1 }
 0x49a   : > { %v2222_v42 = vmul.f32 %v3530_v52, %v4314_v47  ;;  %v2312_v54 = vpack.c.bf16 %v2285_v48, %v2284_v46  ;;  %3602 = vmatpush3.bf16.msra.mxu0 %v4305_v43  ;;  %v2256_v59 = vadd.f32 %v4318_v51, %v2219_v21  ;;  %v1839_v43 = vsub.f32 %v1837_v57, %v1838_v58  ;;  %v1845_v52 = vld [vmem:[%s4537_s8] sm:$0x1] }
 0x49b   : > { %v2126_v56 = vpop.f32.mrf.mxu1  ;;  %3603 = vmatprep.subr.bf16.mxu0 %v4309_v45  ;;  %v2290_v6 = vmax.f32 %v2258_v63, 0.0 }
 0x49c   : > { %v2259_v60 = vadd.f32 %v4318_v51, %v2222_v42  ;;  %v2220_v61 = vmul.f32 %v4314_v47, %v2126_v56  ;;  %3571 = vmatprep.mubr.bf16.mxu0 %v2312_v54  ;;  %v1841_v2 = vadd.f32 1e-05, %v1839_v43  ;;  %v2288_v3 = vmax.f32 %v2256_v59, 0.0 }
 0x49d   : > { %v3533_v35 = vpop.f32.mrf.mxu1  ;;  %3572 = vmatmul.mubr.bf16.gmra.mxu0 %v2313_v26 }
 0x49e   : > { %v2257_v0 = vadd.f32 %v4318_v51, %v2220_v61  ;;  %3604 = vmatpush3.bf16.msra.mxu0 %v4309_v45  ;;  %v2291_v1 = vmax.f32 %v2259_v60, 0.0  ;;  %v2225_v8 = vmul.f32 %v3533_v35, %v4314_v47  ;;  %3866 = vrsqrt.f32 %v1841_v2 }
 0x49f   : > { %v2139_v62 = vpop.f32.mrf.mxu1 }
 0x4a0   : > { %v2289_v4 = vmax.f32 %v2257_v0, 0.0  ;;  %v2223_v5 = vmul.f32 %v4314_v47, %v2139_v62  ;;  %v2315_v12 = vpack.c.bf16 %v2291_v1, %v2290_v6  ;;  %v2262_v7 = vadd.f32 %v4318_v51, %v2225_v8 }
 0x4a1   : > { %v3534_v9 = vpop.f32.mrf.mxu1 }
 0x4a2   : > { %v2226_v10 = vmul.f32 %v3534_v9, %v4314_v47  ;;  %v2314_v11 = vpack.c.bf16 %v2289_v4, %v2288_v3  ;;  %v2260_v13 = vadd.f32 %v4318_v51, %v2223_v5  ;;  %v2294_v23 = vmax.f32 %v2262_v7, 0.0 }
 0x4a3   : > { %v2142_v53 = vpop.f32.mrf.mxu1 }
 0x4a4   : > { %v2263_v45 = vadd.f32 %v4318_v51, %v2226_v10  ;;  %v2224_v14 = vmul.f32 %v4314_v47, %v2142_v53  ;;  %3575 = vmatprep.mubr.bf16.mxu0 %v2314_v11  ;;  %v2292_v19 = vmax.f32 %v2260_v13, 0.0 }
 0x4a5   : > { %v3537_v15 = vpop.f32.mrf.mxu1  ;;  %3576 = vmatmul.mubr.bf16.gmra.mxu0 %v2315_v12 }
 0x4a6   : > { %v2261_v16 = vadd.f32 %v4318_v51, %v2224_v14  ;;  %v2295_v17 = vmax.f32 %v2263_v45, 0.0  ;;  %v2229_v24 = vmul.f32 %v3537_v15, %v4314_v47 }
 0x4a7   : > { %v2155_v18 = vpop.f32.mrf.mxu1 }
 0x4a8   : > { %v2293_v20 = vmax.f32 %v2261_v16, 0.0  ;;  %v2227_v22 = vmul.f32 %v4314_v47, %v2155_v18  ;;  %v2317_v32 = vpack.c.bf16 %v2295_v17, %v2294_v23  ;;  %v2266_v38 = vadd.f32 %v4318_v51, %v2229_v24 }
 0x4a9   : > { %v3538_v25 = vpop.f32.mrf.mxu1 }
 0x4aa   : > { %v2230_v28 = vmul.f32 %v3538_v25, %v4314_v47  ;;  %v2316_v30 = vpack.c.bf16 %v2293_v20, %v2292_v19  ;;  %v2264_v33 = vadd.f32 %v4318_v51, %v2227_v22  ;;  %v2298_v27 = vmax.f32 %v2266_v38, 0.0  ;;  %v3863_v20 = vld [vmem:[#allocation12 + $0x10] sm:$0xff]   ;;  %v3865_v22 = vld [vmem:[#allocation12] sm:$0xff]  }
 0x4ab   : > { %v2158_v31 = vpop.f32.mrf.mxu1  ;;  %v3867_v40 = vpop.eup %3866  ;;  %3605 = vmatprep.subr.bf16.mxu0 %v3863_v20  ;;  %3664 = vmatprep.subr.bf16.mxu1 %v3863_v20 }
 0x4ac   : > { %v2267_v34 = vadd.f32 %v4318_v51, %v2230_v28  ;;  %v2228_v36 = vmul.f32 %v4314_v47, %v2158_v31  ;;  %3579 = vmatprep.mubr.bf16.mxu0 %v2316_v30  ;;  %v1843_v21 = vmul.f32 %v3867_v40, %v1840_v37  ;;  %v2296_v49 = vmax.f32 %v2264_v33, 0.0  ;;  %3606 = vmatpush3.bf16.msra.mxu0 %v3863_v20 }
 0x4ad   : > { %v3541_v39 = vpop.f32.mrf.mxu1  ;;  %3580 = vmatmul.mubr.bf16.gmra.mxu0 %v2317_v32  ;;  %3672 = vmatpush3.bf16.msra.mxu1 %v3863_v20 }
 0x4ae   : > { %v2265_v41 = vadd.f32 %v4318_v51, %v2228_v36  ;;  %v2299_v46 = vmax.f32 %v2267_v34, 0.0  ;;  %v2233_v42 = vmul.f32 %v3541_v39, %v4314_v47  ;;  %1844 = vst [vmem:[#allocation4 + $0x1] sm:$0x1] %v1843_v21  ;;  %v1846_v55 = vmul.f32 %v1843_v21, %v4347_v44 }
 0x4af   : > { %v2171_v48 = vpop.f32.mrf.mxu1 }
 0x4b0   : > { %v2297_v50 = vmax.f32 %v2265_v41, 0.0  ;;  %v2231_v29 = vmul.f32 %v4314_v47, %v2171_v48  ;;  %v2319_v58 = vpack.c.bf16 %v2299_v46, %v2298_v27  ;;  %v1847_v59 = vsub.f32 %v1845_v52, %v1846_v55 }
 0x4b1   : > { %v3542_v54 = vpop.f32.mrf.mxu1  ;;  %v2270_v35 = vadd.f32 %v4318_v51, %v2233_v42 }
 0x4b2   : > { %v2234_v56 = vmul.f32 %v3542_v54, %v4314_v47  ;;  %v2318_v26 = vpack.c.bf16 %v2297_v50, %v2296_v49  ;;  %v2268_v60 = vadd.f32 %v4318_v51, %v2231_v29  ;;  %1848 = vst [vmem:[#allocation5 + $0x1] sm:$0x1] %v1847_v59 }
 0x4b3   : > { %v2174_v57 = vpop.f32.mrf.mxu1  ;;  %v2302_v4 = vmax.f32 %v2270_v35, 0.0 }
 0x4b4   : > { %v2271_v61 = vadd.f32 %v4318_v51, %v2234_v56  ;;  %v2232_v63 = vmul.f32 %v4314_v47, %v2174_v57  ;;  %3583 = vmatprep.mubr.bf16.mxu0 %v2318_v26  ;;  %v2300_v62 = vmax.f32 %v2268_v60, 0.0 }
 0x4b5   : > { %v3545_v43 = vpop.f32.mrf.mxu1  ;;  %3584 = vmatmul.mubr.bf16.gmra.mxu0 %v2319_v58  ;;  %v4399_v23 = vld [vmem:[#allocation4 + $0x1] ss:$0 sm:$0xff] }
 0x4b6   : > { %v2269_v44 = vadd.f32 %v4318_v51, %v2232_v63  ;;  %v2303_v0 = vmax.f32 %v2271_v61, 0.0  ;;  %v2237_v5 = vmul.f32 %v3545_v43, %v4314_v47 }
 0x4b7   : > { %v2187_v1 = vpop.f32.mrf.mxu1 }
 0x4b8   : > { %v2301_v2 = vmax.f32 %v2269_v44, 0.0  ;;  %v2235_v3 = vmul.f32 %v4314_v47, %v2187_v1  ;;  %v2321_v11 = vpack.c.bf16 %v2303_v0, %v2302_v4  ;;  %v2274_v45 = vadd.f32 %v4318_v51, %v2237_v5 }
 0x4b9   : > { %v3546_v6 = vpop.f32.mrf.mxu1  ;;  %v4404_v32 = vld [vmem:[#allocation5 + $0x1] ss:$0 sm:$0xff] }
 0x4ba   : > { %v2238_v8 = vmul.f32 %v3546_v6, %v4314_v47  ;;  %v2320_v9 = vpack.c.bf16 %v2301_v2, %v2300_v62  ;;  %v2272_v53 = vadd.f32 %v4318_v51, %v2235_v3  ;;  %v2306_v17 = vmax.f32 %v2274_v45, 0.0 }
 0x4bb   : > { %v2190_v10 = vpop.f32.mrf.mxu1 }
 0x4bc   : > { %v2275_v12 = vadd.f32 %v4318_v51, %v2238_v8  ;;  %v2236_v13 = vmul.f32 %v4314_v47, %v2190_v10  ;;  %3587 = vmatprep.mubr.bf16.mxu0 %v2320_v9  ;;  %v2304_v15 = vmax.f32 %v2272_v53, 0.0  ;;  %v3864_v47 = vld [vmem:[#allocation12 + $0x8] sm:$0xff]  }
 0x4bd   : > { %3588 = vmatmul.mubr.bf16.gmra.mxu0 %v2321_v11  ;;  %3607 = vmatprep.subr.bf16.mxu0 %v3864_v47 }
 0x4be   : > { %v2273_v14 = vadd.f32 %v4318_v51, %v2236_v13  ;;  %v2307_v7 = vmax.f32 %v2275_v12, 0.0  ;;  %3665 = vmatprep.subr.bf16.mxu1 %v3864_v47  ;;  %3608 = vmatpush3.bf16.msra.mxu0 %v3864_v47 }
 0x4bf   : > { %3673 = vmatpush3.bf16.msra.mxu1 %v3864_v47  ;;  %3609 = vmatprep.subr.bf16.mxu0 %v3865_v22 }
 0x4c0   : > { %v2305_v16 = vmax.f32 %v2273_v14, 0.0  ;;  %v2323_v19 = vpack.c.bf16 %v2307_v7, %v2306_v17  ;;  %3666 = vmatprep.subr.bf16.mxu1 %v3865_v22 }
 0x4c2   : > { %v2322_v18 = vpack.c.bf16 %v2305_v16, %v2304_v15  ;;  %3610 = vmatpush3.bf16.msra.mxu0 %v3865_v22 }
 0x4c3   : > { %3674 = vmatpush3.bf16.msra.mxu1 %v3865_v22 }
 0x4c4   : > { %3591 = vmatprep.mubr.bf16.mxu0 %v2322_v18 }
 0x4c5   : > { %3592 = vmatmul.mubr.bf16.gmra.mxu0 %v2323_v19 }
 0x54d   : > { %v3565_v51 = vpop.f32.mrf.mxu0 }
 0x54e   : > { %v2556_v28 = vmul.f32 %v3565_v51, %v4399_v23 }
 0x54f   : > { %v2422_v24 = vpop.f32.mrf.mxu0 }
 0x550   : > { %v2554_v25 = vmul.f32 %v4399_v23, %v2422_v24  ;;  %v2593_v38 = vadd.f32 %v4404_v32, %v2556_v28 }
 0x551   : > { %v3566_v30 = vpop.f32.mrf.mxu0 }
 0x552   : > { %v2557_v31 = vmul.f32 %v3566_v30, %v4399_v23  ;;  %v2591_v34 = vadd.f32 %v4404_v32, %v2554_v25  ;;  %v2625_v50 = vmax.f32 %v2593_v38, 0.0 }
 0x553   : > { %v2425_v33 = vpop.f32.mrf.mxu0 }
 0x554   : > { %v2594_v36 = vadd.f32 %v4404_v32, %v2557_v31  ;;  %v2555_v37 = vmul.f32 %v4399_v23, %v2425_v33  ;;  %v2623_v48 = vmax.f32 %v2591_v34, 0.0 }
 0x555   : > { %v3569_v39 = vpop.f32.mrf.mxu0 }
 0x556   : > { %v2592_v40 = vadd.f32 %v4404_v32, %v2555_v37  ;;  %v2626_v41 = vmax.f32 %v2594_v36, 0.0  ;;  %v2560_v29 = vmul.f32 %v3569_v39, %v4399_v23 }
 0x557   : > { %v2438_v46 = vpop.f32.mrf.mxu0 }
 0x558   : > { %v2624_v21 = vmax.f32 %v2592_v40, 0.0  ;;  %v2558_v49 = vmul.f32 %v4399_v23, %v2438_v46  ;;  %v2656_v54 = vpack.c.bf16 %v2626_v41, %v2625_v50  ;;  %v2597_v58 = vadd.f32 %v4404_v32, %v2560_v29 }
 0x559   : > { %v3570_v52 = vpop.f32.mrf.mxu0 }
 0x55a   : > { %v2561_v27 = vmul.f32 %v3570_v52, %v4399_v23  ;;  %v2655_v42 = vpack.c.bf16 %v2624_v21, %v2623_v48  ;;  %v2595_v56 = vadd.f32 %v4404_v32, %v2558_v49  ;;  %v2629_v0 = vmax.f32 %v2597_v58, 0.0 }
 0x55b   : > { %v2441_v55 = vpop.f32.mrf.mxu0 }
 0x55c   : > { %v2598_v26 = vadd.f32 %v4404_v32, %v2561_v27  ;;  %v2559_v57 = vmul.f32 %v4399_v23, %v2441_v55  ;;  %3611 = vmatprep.mubr.bf16.mxu0 %v2655_v42  ;;  %v2627_v35 = vmax.f32 %v2595_v56, 0.0 }
 0x55d   : > { %v3573_v59 = vpop.f32.mrf.mxu0  ;;  %3612 = vmatmul.mubr.bf16.vlgmr.msra.gmra.mxu0 %v2656_v54 }
 0x55e   : > { %v2596_v60 = vadd.f32 %v4404_v32, %v2559_v57  ;;  %v2630_v61 = vmax.f32 %v2598_v26, 0.0  ;;  %v2564_v1 = vmul.f32 %v3573_v59, %v4399_v23 }
 0x55f   : > { %v2454_v63 = vpop.f32.mrf.mxu0 }
 0x560   : > { %v2628_v43 = vmax.f32 %v2596_v60, 0.0  ;;  %v2562_v44 = vmul.f32 %v4399_v23, %v2454_v63  ;;  %v2658_v5 = vpack.c.bf16 %v2630_v61, %v2629_v0  ;;  %v2601_v10 = vadd.f32 %v4404_v32, %v2564_v1 }
 0x561   : > { %v3574_v62 = vpop.f32.mrf.mxu0 }
 0x562   : > { %v2565_v2 = vmul.f32 %v3574_v62, %v4399_v23  ;;  %v2657_v3 = vpack.c.bf16 %v2628_v43, %v2627_v35  ;;  %v2599_v6 = vadd.f32 %v4404_v32, %v2562_v44  ;;  %v2633_v15 = vmax.f32 %v2601_v10, 0.0 }
 0x563   : > { %v2457_v4 = vpop.f32.mrf.mxu0 }
 0x564   : > { %v2602_v8 = vadd.f32 %v4404_v32, %v2565_v2  ;;  %v2563_v9 = vmul.f32 %v4399_v23, %v2457_v4  ;;  %3615 = vmatprep.mubr.bf16.mxu0 %v2657_v3  ;;  %v2631_v45 = vmax.f32 %v2599_v6, 0.0 }
 0x565   : > { %v3577_v11 = vpop.f32.mrf.mxu0  ;;  %3616 = vmatmul.mubr.bf16.gmra.mxu0 %v2658_v5 }
 0x566   : > { %v2600_v53 = vadd.f32 %v4404_v32, %v2563_v9  ;;  %v2634_v12 = vmax.f32 %v2602_v8, 0.0  ;;  %v2568_v16 = vmul.f32 %v3577_v11, %v4399_v23 }
 0x567   : > { %v2470_v13 = vpop.f32.mrf.mxu0 }
 0x568   : > { %v2632_v14 = vmax.f32 %v2600_v53, 0.0  ;;  %v2566_v7 = vmul.f32 %v4399_v23, %v2470_v13  ;;  %v2660_v20 = vpack.c.bf16 %v2634_v12, %v2633_v15  ;;  %v2605_v25 = vadd.f32 %v4404_v32, %v2568_v16 }
 0x569   : > { %v3578_v17 = vpop.f32.mrf.mxu0 }
 0x56a   : > { %v2569_v18 = vmul.f32 %v3578_v17, %v4399_v23  ;;  %v2659_v19 = vpack.c.bf16 %v2632_v14, %v2631_v45  ;;  %v2603_v22 = vadd.f32 %v4404_v32, %v2566_v7  ;;  %v2637_v38 = vmax.f32 %v2605_v25, 0.0 }
 0x56b   : > { %v2473_v47 = vpop.f32.mrf.mxu0 }
 0x56c   : > { %v2606_v51 = vadd.f32 %v4404_v32, %v2569_v18  ;;  %v2567_v24 = vmul.f32 %v4399_v23, %v2473_v47  ;;  %3619 = vmatprep.mubr.bf16.mxu1 %v2659_v19  ;;  %v2635_v34 = vmax.f32 %v2603_v22, 0.0 }
 0x56d   : > { %v3581_v28 = vpop.f32.mrf.mxu0  ;;  %3620 = vmatmul.mubr.bf16.vlgmr.msra.gmra.mxu1 %v2660_v20 }
 0x56e   : > { %v2604_v30 = vadd.f32 %v4404_v32, %v2567_v24  ;;  %v2638_v31 = vmax.f32 %v2606_v51, 0.0  ;;  %v2572_v39 = vmul.f32 %v3581_v28, %v4399_v23 }
 0x56f   : > { %v2486_v33 = vpop.f32.mrf.mxu0 }
 0x570   : > { %v2636_v36 = vmax.f32 %v2604_v30, 0.0  ;;  %v2570_v37 = vmul.f32 %v4399_v23, %v2486_v33  ;;  %v2662_v21 = vpack.c.bf16 %v2638_v31, %v2637_v38  ;;  %v2609_v52 = vadd.f32 %v4404_v32, %v2572_v39 }
 0x571   : > { %v3582_v40 = vpop.f32.mrf.mxu0 }
 0x572   : > { %v2573_v41 = vmul.f32 %v3582_v40, %v4399_v23  ;;  %v2661_v46 = vpack.c.bf16 %v2636_v36, %v2635_v34  ;;  %v2607_v49 = vadd.f32 %v4404_v32, %v2570_v37  ;;  %v2641_v58 = vmax.f32 %v2609_v52, 0.0  ;;  %v4470_v52 = vld [vmem:[%s4533_s4] ss:$0 sm:$0xff] }
 0x573   : > { %v2489_v48 = vpop.f32.mrf.mxu0 }
 0x574   : > { %v2610_v50 = vadd.f32 %v4404_v32, %v2573_v41  ;;  %v2571_v29 = vmul.f32 %v4399_v23, %v2489_v48  ;;  %3623 = vmatprep.mubr.bf16.mxu1 %v2661_v46  ;;  %v2639_v56 = vmax.f32 %v2607_v49, 0.0 }
 0x575   : > { %v3585_v27 = vpop.f32.mrf.mxu0  ;;  %3624 = vmatmul.mubr.bf16.gmra.mxu1 %v2662_v21 }
 0x576   : > { %v2608_v42 = vadd.f32 %v4404_v32, %v2571_v29  ;;  %v2642_v54 = vmax.f32 %v2610_v50, 0.0  ;;  %v2576_v59 = vmul.f32 %v3585_v27, %v4399_v23 }
 0x577   : > { %v2502_v55 = vpop.f32.mrf.mxu0 }
 0x578   : > { %v2640_v26 = vmax.f32 %v2608_v42, 0.0  ;;  %v2574_v57 = vmul.f32 %v4399_v23, %v2502_v55  ;;  %v2664_v43 = vpack.c.bf16 %v2642_v54, %v2641_v58  ;;  %v2613_v62 = vadd.f32 %v4404_v32, %v2576_v59 }
 0x579   : > { %v3586_v60 = vpop.f32.mrf.mxu0 }
 0x57a   : > { %v2577_v61 = vmul.f32 %v3586_v60, %v4399_v23  ;;  %v2663_v63 = vpack.c.bf16 %v2640_v26, %v2639_v56  ;;  %v2611_v44 = vadd.f32 %v4404_v32, %v2574_v57  ;;  %v2645_v10 = vmax.f32 %v2613_v62, 0.0 }
 0x57b   : > { %v2505_v35 = vpop.f32.mrf.mxu0 }
 0x57c   : > { %v2614_v0 = vadd.f32 %v4404_v32, %v2577_v61  ;;  %v2575_v1 = vmul.f32 %v4399_v23, %v2505_v35  ;;  %3627 = vmatprep.mubr.bf16.mxu1 %v2663_v63  ;;  %v2643_v6 = vmax.f32 %v2611_v44, 0.0 }
 0x57d   : > { %v3589_v2 = vpop.f32.mrf.mxu0  ;;  %3628 = vmatmul.mubr.bf16.gmra.mxu1 %v2664_v43 }
 0x57e   : > { %v2612_v3 = vadd.f32 %v4404_v32, %v2575_v1  ;;  %v2646_v4 = vmax.f32 %v2614_v0, 0.0  ;;  %v2580_v11 = vmul.f32 %v3589_v2, %v4399_v23 }
 0x57f   : > { %v2518_v5 = vpop.f32.mrf.mxu0 }
 0x580   : > { %v2644_v8 = vmax.f32 %v2612_v3, 0.0  ;;  %v2578_v9 = vmul.f32 %v4399_v23, %v2518_v5  ;;  %v2666_v14 = vpack.c.bf16 %v2646_v4, %v2645_v10  ;;  %v2617_v17 = vadd.f32 %v4404_v32, %v2580_v11 }
 0x581   : > { %v3590_v53 = vpop.f32.mrf.mxu0 }
 0x582   : > { %v2581_v12 = vmul.f32 %v3590_v53, %v4399_v23  ;;  %v2665_v13 = vpack.c.bf16 %v2644_v8, %v2643_v6  ;;  %v2615_v7 = vadd.f32 %v4404_v32, %v2578_v9  ;;  %v2649_v25 = vmax.f32 %v2617_v17, 0.0 }
 0x583   : > { %v2521_v45 = vpop.f32.mrf.mxu0 }
 0x584   : > { %v2618_v15 = vadd.f32 %v4404_v32, %v2581_v12  ;;  %v2579_v16 = vmul.f32 %v4399_v23, %v2521_v45  ;;  %3631 = vmatprep.mubr.bf16.mxu1 %v2665_v13  ;;  %v2647_v22 = vmax.f32 %v2615_v7, 0.0 }
 0x585   : > { %v3593_v18 = vpop.f32.mrf.mxu0  ;;  %3632 = vmatmul.mubr.bf16.gmra.mxu1 %v2666_v14 }
 0x586   : > { %v2616_v19 = vadd.f32 %v4404_v32, %v2579_v16  ;;  %v2650_v20 = vmax.f32 %v2618_v15, 0.0  ;;  %v2584_v28 = vmul.f32 %v3593_v18, %v4399_v23 }
 0x587   : > { %v2534_v47 = vpop.f32.mrf.mxu0 }
 0x588   : > { %v2648_v51 = vmax.f32 %v2616_v19, 0.0  ;;  %v2582_v24 = vmul.f32 %v4399_v23, %v2534_v47  ;;  %v2668_v36 = vpack.c.bf16 %v2650_v20, %v2649_v25  ;;  %v2621_v40 = vadd.f32 %v4404_v32, %v2584_v28 }
 0x589   : > { %v3594_v30 = vpop.f32.mrf.mxu0 }
 0x58a   : > { %v2585_v31 = vmul.f32 %v3594_v30, %v4399_v23  ;;  %v2667_v33 = vpack.c.bf16 %v2648_v51, %v2647_v22  ;;  %v2619_v37 = vadd.f32 %v4404_v32, %v2582_v24  ;;  %v2653_v49 = vmax.f32 %v2621_v40, 0.0 }
 0x58b   : > { %v2537_v34 = vpop.f32.mrf.mxu0 }
 0x58c   : > { %v2622_v38 = vadd.f32 %v4404_v32, %v2585_v31  ;;  %v2583_v39 = vmul.f32 %v4399_v23, %v2537_v34  ;;  %3635 = vmatprep.mubr.bf16.mxu1 %v2667_v33  ;;  %v2651_v48 = vmax.f32 %v2619_v37, 0.0 }
 0x58d   : > { %3636 = vmatmul.mubr.bf16.gmra.mxu1 %v2668_v36 }
 0x58e   : > { %v2620_v41 = vadd.f32 %v4404_v32, %v2583_v39  ;;  %v2654_v46 = vmax.f32 %v2622_v38, 0.0 }
 0x590   : > { %v2652_v21 = vmax.f32 %v2620_v41, 0.0  ;;  %v2670_v29 = vpack.c.bf16 %v2654_v46, %v2653_v49 }
 0x592   : > { %v2669_v50 = vpack.c.bf16 %v2652_v21, %v2651_v48 }
 0x594   : > { %3639 = vmatprep.mubr.bf16.mxu1 %v2669_v50 }
 0x595   : > { %3640 = vmatmul.mubr.bf16.gmra.mxu1 %v2670_v29 }
 0x61d   : > { %v3613_v23 = vpop.f32.mrf.mxu0 }
 0x61e   : > { %v2785_v27 = vadd.f32 %v3613_v23, %v4470_v52 }
 0x61f   : > { %v2776_v42 = vpop.f32.mrf.mxu0 }
 0x620   : > { %2905 = vst [vmem:[#allocation14 + $0x10] sm:$0xff] %v2785_v27  ;;  %v2777_v32 = vadd.f32 %v4470_v52, %v2776_v42 }
 0x621   : > { %v3614_v54 = vpop.f32.mrf.mxu0 }
 0x622   : > { %2903 = vst [vmem:[#allocation14] sm:$0xff] %v2777_v32  ;;  %v2788_v55 = vadd.f32 %v3614_v54, %v4470_v52 }
 0x623   : > { %v2779_v56 = vpop.f32.mrf.mxu0 }
 0x624   : > { %2906 = vst [vmem:[#allocation14 + $0x18] sm:$0xff] %v2788_v55  ;;  %v2780_v26 = vadd.f32 %v4470_v52, %v2779_v56 }
 0x625   : > { %v3617_v57 = vpop.f32.mrf.mxu0 }
 0x626   : > { %2904 = vst [vmem:[#allocation14 + $0x8] sm:$0xff] %v2780_v26  ;;  %v2801_v58 = vadd.f32 %v3617_v57, %v4470_v52 }
 0x627   : > { %v2792_v59 = vpop.f32.mrf.mxu0 }
 0x628   : > { %2909 = vst [vmem:[#allocation14 + $0x30] sm:$0xff] %v2801_v58  ;;  %v2793_v60 = vadd.f32 %v4470_v52, %v2792_v59 }
 0x629   : > { %v3618_v61 = vpop.f32.mrf.mxu0 }
 0x62a   : > { %2907 = vst [vmem:[#allocation14 + $0x20] sm:$0xff] %v2793_v60  ;;  %v2804_v63 = vadd.f32 %v3618_v61, %v4470_v52 }
 0x62b   : > { %v2795_v35 = vpop.f32.mrf.mxu0 }
 0x62c   : > { %2910 = vst [vmem:[#allocation14 + $0x38] sm:$0xff] %v2804_v63  ;;  %v2796_v43 = vadd.f32 %v4470_v52, %v2795_v35 }
 0x62d   : > { %v3621_v44 = vpop.f32.mrf.mxu1 }
 0x62e   : > { %2908 = vst [vmem:[#allocation14 + $0x28] sm:$0xff] %v2796_v43  ;;  %v2817_v0 = vadd.f32 %v3621_v44, %v4470_v52 }
 0x62f   : > { %v2808_v1 = vpop.f32.mrf.mxu1 }
 0x630   : > { %2913 = vst [vmem:[#allocation14 + $0x50] sm:$0xff] %v2817_v0  ;;  %v2809_v62 = vadd.f32 %v4470_v52, %v2808_v1 }
 0x631   : > { %v3622_v2 = vpop.f32.mrf.mxu1 }
 0x632   : > { %2911 = vst [vmem:[#allocation14 + $0x40] sm:$0xff] %v2809_v62  ;;  %v2820_v3 = vadd.f32 %v3622_v2, %v4470_v52 }
 0x633   : > { %v2811_v4 = vpop.f32.mrf.mxu1 }
 0x634   : > { %2914 = vst [vmem:[#allocation14 + $0x58] sm:$0xff] %v2820_v3  ;;  %v2812_v5 = vadd.f32 %v4470_v52, %v2811_v4 }
 0x635   : > { %v3625_v6 = vpop.f32.mrf.mxu1 }
 0x636   : > { %2912 = vst [vmem:[#allocation14 + $0x48] sm:$0xff] %v2812_v5  ;;  %v2833_v8 = vadd.f32 %v3625_v6, %v4470_v52 }
 0x637   : > { %v2824_v9 = vpop.f32.mrf.mxu1 }
 0x638   : > { %2917 = vst [vmem:[#allocation14 + $0x70] sm:$0xff] %v2833_v8  ;;  %v2825_v10 = vadd.f32 %v4470_v52, %v2824_v9 }
 0x639   : > { %v3626_v11 = vpop.f32.mrf.mxu1 }
 0x63a   : > { %2915 = vst [vmem:[#allocation14 + $0x60] sm:$0xff] %v2825_v10  ;;  %v2836_v53 = vadd.f32 %v3626_v11, %v4470_v52 }
 0x63b   : > { %v2827_v12 = vpop.f32.mrf.mxu1 }
 0x63c   : > { %2918 = vst [vmem:[#allocation14 + $0x78] sm:$0xff] %v2836_v53  ;;  %v2828_v13 = vadd.f32 %v4470_v52, %v2827_v12 }
 0x63d   : > { %v3629_v45 = vpop.f32.mrf.mxu1 }
 0x63e   : > { %2916 = vst [vmem:[#allocation14 + $0x68] sm:$0xff] %v2828_v13  ;;  %v2849_v14 = vadd.f32 %v3629_v45, %v4470_v52 }
 0x63f   : > { %v2840_v7 = vpop.f32.mrf.mxu1 }
 0x640   : > { %2921 = vst [vmem:[#allocation14 + $0x90] sm:$0xff] %v2849_v14  ;;  %v2841_v15 = vadd.f32 %v4470_v52, %v2840_v7 }
 0x641   : > { %v3630_v16 = vpop.f32.mrf.mxu1 }
 0x642   : > { %2919 = vst [vmem:[#allocation14 + $0x80] sm:$0xff] %v2841_v15  ;;  %v2852_v17 = vadd.f32 %v3630_v16, %v4470_v52 }
 0x643   : > { %v2843_v18 = vpop.f32.mrf.mxu1 }
 0x644   : > { %2922 = vst [vmem:[#allocation14 + $0x98] sm:$0xff] %v2852_v17  ;;  %v2844_v19 = vadd.f32 %v4470_v52, %v2843_v18 }
 0x645   : > { %v3633_v20 = vpop.f32.mrf.mxu1 }
 0x646   : > { %2920 = vst [vmem:[#allocation14 + $0x88] sm:$0xff] %v2844_v19  ;;  %v2865_v47 = vadd.f32 %v3633_v20, %v4470_v52 }
 0x647   : > { %v2856_v22 = vpop.f32.mrf.mxu1 }
 0x648   : > { %2925 = vst [vmem:[#allocation14 + $0xb0] sm:$0xff] %v2865_v47  ;;  %v2857_v51 = vadd.f32 %v4470_v52, %v2856_v22 }
 0x649   : > { %v3634_v24 = vpop.f32.mrf.mxu1 }
 0x64a   : > { %2923 = vst [vmem:[#allocation14 + $0xa0] sm:$0xff] %v2857_v51  ;;  %v2868_v25 = vadd.f32 %v3634_v24, %v4470_v52 }
 0x64b   : > { %v2859_v28 = vpop.f32.mrf.mxu1 }
 0x64c   : > { %2926 = vst [vmem:[#allocation14 + $0xb8] sm:$0xff] %v2868_v25  ;;  %v2860_v30 = vadd.f32 %v4470_v52, %v2859_v28 }
 0x64d   : > { %v3637_v31 = vpop.f32.mrf.mxu1 }
 0x64e   : > { %2924 = vst [vmem:[#allocation14 + $0xa8] sm:$0xff] %v2860_v30  ;;  %v2881_v33 = vadd.f32 %v3637_v31, %v4470_v52 }
 0x64f   : > { %v2872_v34 = vpop.f32.mrf.mxu1 }
 0x650   : > { %2929 = vst [vmem:[#allocation14 + $0xd0] sm:$0xff] %v2881_v33  ;;  %v2873_v36 = vadd.f32 %v4470_v52, %v2872_v34 }
 0x651   : > { %v3638_v37 = vpop.f32.mrf.mxu1 }
 0x652   : > { %2927 = vst [vmem:[#allocation14 + $0xc0] sm:$0xff] %v2873_v36  ;;  %v2884_v38 = vadd.f32 %v3638_v37, %v4470_v52 }
 0x653   : > { %v2875_v39 = vpop.f32.mrf.mxu1 }
 0x654   : > { %2930 = vst [vmem:[#allocation14 + $0xd8] sm:$0xff] %v2884_v38  ;;  %v2876_v40 = vadd.f32 %v4470_v52, %v2875_v39 }
 0x655   : > { %v3641_v41 = vpop.f32.mrf.mxu1 }
 0x656   : > { %2928 = vst [vmem:[#allocation14 + $0xc8] sm:$0xff] %v2876_v40  ;;  %v2897_v46 = vadd.f32 %v3641_v41, %v4470_v52 }
 0x657   : > { %v2888_v48 = vpop.f32.mrf.mxu1 }
 0x658   : > { %2933 = vst [vmem:[#allocation14 + $0xf0] sm:$0xff] %v2897_v46  ;;  %v2889_v21 = vadd.f32 %v4470_v52, %v2888_v48 }
 0x659   : > { %v3642_v49 = vpop.f32.mrf.mxu1 }
 0x65a   : > { %2931 = vst [vmem:[#allocation14 + $0xe0] sm:$0xff] %v2889_v21  ;;  %v2900_v50 = vadd.f32 %v3642_v49, %v4470_v52 }
 0x65b   : > { %v2891_v29 = vpop.f32.mrf.mxu1 }
 0x65c   : > { %2934 = vst [vmem:[#allocation14 + $0xf8] sm:$0xff] %v2900_v50  ;;  %v2892_v23 = vadd.f32 %v4470_v52, %v2891_v29 }
 0x65e   : > { %2932 = vst [vmem:[#allocation14 + $0xe8] sm:$0xff] %v2892_v23 }
 0x65f PF: > { %p4506_p7 = scmp.eq.s32.totalorder %s3052_s12, 2  ;;  %s4046_s26 = smov [#allocation14]  }
 0x660   : > { %s2951_s27 = sshll.u32 %s4046_s26, 4  ;;  %s2952_s27 = int_to_ptr.vmem [resolvable:$true] %s2951_s27 }
 0x661   : > { %s3972_s28 = scalar_lea.vmem %s2952_s27, 4096  ;;  %s3978_s29 = scalar_lea.vmem %s2952_s27, 8192 }
 0x662   : > { %p3973_p4 = scmp.ne.s32.totalorder %s2952_s27, %s3972_s28  ;;  %p3979_p10 = scmp.lt.s32.totalorder %s2952_s27, %s2952_s27 }
 0x663   : > { %p3980_p11 = scmp.lt.s32.totalorder %s3978_s29, %s3972_s28 }
 0x664   : > { %p3974_p8 = pnand %p3973_p4, %p4506_p7 }
 0x665   : > { %p3981_p12 = por %p3980_p11, %p3979_p10 }
 0x666   : > { %p3975_p9 = pneg %p3974_p8 }
 0x668   : > { %p3982_p6 = pnand %p3981_p12, %p3975_p9 }
 0x66a   : > { %3985 = shalt.err (!%p3982_p6)
}
 0x66b   : > { %s4047_s16 = smov 128   ;;  %s4048_s12 = smov 8  }
 0x66c   : > { %3692 = dma.vmem_to_hbm [thread:$0]  (%p4506_p7), %s2952_s27, 4096, %s4538_s9, [#allocation8], %s4047_s16, %s4047_s16, %s4048_s12  }
 0x66d PF: > { %p3721_p13 = scmp.ge.s32.totalorder %s4034_s11, 2  ;;  %p3722_p0 = scmp.eq.s32.totalorder %s3053_s13, 2 }
 0x66f   : > { %p3709_p1 = pnand %p3722_p0, %p3721_p13 }
 0x671   : > { %p3710_p3 = pneg %p3709_p1 }
 0x673   : > { %4021 = dma.done.wait (%p3710_p3), [#allocation8], 4096  }
 0x674   : > { %4023 = vsyncadd (%p3710_p3), [#allocation8], 4294963200  ;;  %s25_s11 = sadd.s32 1, %s4034_s11   ;;  %s4544_s30 = smov %s4030_s10 }
 0x675   : > { %p22_p2 = scmp.ge.s32.totalorder %s25_s11, 5   ;;  %s4545_s10 = smov %s4547_s19 }
 0x677   :  { %24 = sbr.rel (!%p22_p2) target bundleno = 6 (0x6), region = 134 }
 0x67c   :  { %2972 = vsyncpa [#allocation7], 1 }
 0x67d   :  { %2974 = vsyncpa [#allocation7 + $0x1], 1 }
 0x67e   :  { %2975 = vsyncpa [#allocation10], 1 }
 0x67f   :  { %2976 = vsyncpa [#allocation13], 1 }
 0x680   :  { %2977 = vsyncpa [#allocation8], 1 }
 0x681   :  { %2979 = vsyncpa [#allocation8 + $0x1], 1 }

</bundles_post_ra>
